<compile_context>
chip_gen: v7x
topology: tpu7x:2x2x1
jax: 0.10.0
libtpu: 0.0.40
codegen_flags: <defaults>
</compile_context>

<pallas_src>
import functools

import jax
import jax.numpy as jnp
from jax.experimental import pallas as pl
from jax.experimental.pallas import tpu as pltpu

# ---------------------------------------------------------------------------
# config (mirrors `opt` in the PyTorch module; sizes picked lane-dense)
# ---------------------------------------------------------------------------
VOCAB = 128
SEQ = 8
HIDDEN = 128
PROJ = 128           # opt.projection_size
BSZ = 8
QUEUE_SIZE = 128     # opt.queue_size (must be divisible by BSZ, as in torch)
MOMENTUM = 0.999     # opt.momentum
TEMPERATURE = 0.05   # opt.temperature
LABEL_SMOOTH = 0.1   # opt.label_smoothing
NORM_QUERY = True    # opt.norm_query
NORM_DOC = True      # opt.norm_doc

STATS_ROWS = 8       # (8, 128) lane/sublane-dense stats block: row 0 holds
STATS_COLS = 128     # [loss, accuracy, stdq, stdk, 0...]


# ---------------------------------------------------------------------------
# in-kernel helpers (traced inside the fused kernel)
# ---------------------------------------------------------------------------
def _encode(tok, maskf, emb, w, b):
    """Synthetic retriever: one-hot(tokens) @ emb on the MXU (gather),
    masked mean pooling, linear projection.  MXU operands are bf16."""
    B, S = tok.shape
    V = emb.shape[0]
    onehot = (tok[:, :, None]
              == jax.lax.broadcasted_iota(jnp.int32, (B, S, V), 2)
              ).astype(jnp.float32)                                  # (B,S,V)
    counts = jnp.sum(onehot * maskf[:, :, None], axis=1)             # (B,V)
    denom = jnp.maximum(jnp.sum(maskf, axis=1, keepdims=True), 1.0)  # (B,1)
    # counts are exact small integers (<= SEQ) -> bf16 cast is exact.
    pooled = jnp.dot(counts.astype(jnp.bfloat16), emb.astype(jnp.bfloat16),
                     preferred_element_type=jnp.float32)             # (B,H)
    # NOTE: approx reciprocal (EUP) deviates ~2^-12 rel. from exact division.
    pooled = pooled * pl.reciprocal(denom, approx=True)
    return jnp.dot(pooled.astype(jnp.bfloat16), w.astype(jnp.bfloat16),
                   preferred_element_type=jnp.float32) + b           # (B,P)


def _l2_normalize(x):
    sumsq = jnp.sum(x * x, axis=1, keepdims=True)
    return x * jax.lax.rsqrt(jnp.maximum(sumsq, 1e-24))              # EUP


def _std_mean(x):
    """torch.std(x, dim=0).mean() with Bessel correction; returns (1,1)."""
    n = x.shape[0]
    mu = jnp.mean(x, axis=0, keepdims=True)
    var = jnp.sum((x - mu) ** 2, axis=0, keepdims=True) / (n - 1)
    return jnp.mean(jnp.sqrt(var), axis=1, keepdims=True)


# ---------------------------------------------------------------------------
# fused MoCo kernel
# ---------------------------------------------------------------------------
def _moco_fused_kernel(ptr_ref,                                   # SMEM (1,) i32 (scalar prefetch)
                       qtok_ref, qmask_ref, ktok_ref, kmask_ref,  # VMEM
                       embq_ref, wq_ref, bq_ref,                  # query encoder
                       embk_ref, wk_ref, bk_ref,                  # key encoder
                       queue_ref,                                 # (K, P) read-only
                       embk_out_ref, wk_out_ref, bk_out_ref,      # updated key enc (aliased)
                       queue_win_ref,                             # (BSZ, P) enqueue window (aliased)
                       stats_ref,                                 # (8, 128) stats
                       *, momentum, temperature, label_smoothing,
                       norm_query, norm_doc):
    del ptr_ref  # consumed by the output index_map (windowed enqueue)
    m = momentum
    emb_q = embq_ref[...]
    w_q = wq_ref[...]
    b_q = bq_ref[...]

    # --- momentum update of the key encoder:  p_k = m*p_k + (1-m)*p_q (f32) ---
    emb_k = embk_ref[...] * m + emb_q * (1.0 - m)
    w_k = wk_ref[...] * m + w_q * (1.0 - m)
    b_k = bk_ref[...] * m + b_q * (1.0 - m)
    embk_out_ref[...] = emb_k
    wk_out_ref[...] = w_k
    bk_out_ref[...] = b_k

    # --- encoders (key encoder uses the freshly updated params, as in torch) ---
    q = _encode(qtok_ref[...], qmask_ref[...], emb_q, w_q, b_q)
    k = _encode(ktok_ref[...], kmask_ref[...], emb_k, w_k, b_k)
    if norm_query:
        q = _l2_normalize(q)
    if norm_doc:
        k = _l2_normalize(k)

    # --- MoCo logits (class 0 is the positive) ---
    inv_t = 1.0 / temperature
    l_pos = jnp.sum(q * k, axis=1, keepdims=True) * inv_t                 # (B,1)
    # queue is (K, P); contract last dims of q and queue on the MXU (bf16).
    # Load kept adjacent to its only use so the queue isn't live across softmax.
    l_neg = jax.lax.dot_general(
        q.astype(jnp.bfloat16), queue_ref[...].astype(jnp.bfloat16),
        (((1,), (1,)), ((), ())),
        preferred_element_type=jnp.float32) * inv_t                       # (B,K)

    num_classes = l_neg.shape[1] + 1                                      # K+1
    max_neg = jnp.max(l_neg, axis=1, keepdims=True)
    mx = jnp.maximum(l_pos, max_neg)
    sumexp = jnp.exp(l_pos - mx) + jnp.sum(jnp.exp(l_neg - mx), axis=1,
                                           keepdims=True)
    lse = jnp.log(sumexp) + mx
    logp_true = l_pos - lse
    sum_logp = (l_pos + jnp.sum(l_neg, axis=1, keepdims=True)) - num_classes * lse

    eps = label_smoothing
    per_ex = -((1.0 - eps) * logp_true + (eps / num_classes) * sum_logp)
    loss = jnp.mean(per_ex, axis=0, keepdims=True)                        # (1,1)

    # argmax(logits) == 0  <=>  l_pos >= max(l_neg) (first-index tie-break)
    acc = 100.0 * jnp.mean((l_pos >= max_neg).astype(jnp.float32),
                           axis=0, keepdims=True)
    stdq = _std_mean(q)
    stdk = _std_mean(k)

    # --- pack the 4 scalar stats into one lane/sublane-dense (8, 128) block ---
    lane = jax.lax.broadcasted_iota(jnp.int32, stats_ref.shape, 1)
    stats_ref[...] = (jnp.where(lane == 0, loss, 0.0)
                      + jnp.where(lane == 1, acc, 0.0)
                      + jnp.where(lane == 2, stdq, 0.0)
                      + jnp.where(lane == 3, stdk, 0.0))

    # --- enqueue: the aliased output BlockSpec places this (BSZ, PROJ) tile at
    # rows [ptr, ptr+BSZ) of the queue; no wrap-around since ptr is a multiple
    # of BSZ and queue_size % BSZ == 0 (asserted in the wrapper, as in torch).
    queue_win_ref[...] = k


# ---------------------------------------------------------------------------
# full MoCo forward (one pallas_call + trivial scalar glue)
# ---------------------------------------------------------------------------
def moco_forward(params_q, params_k, queue, queue_ptr,
                 q_tokens, q_mask, k_tokens, k_mask):
    bsz = q_tokens.shape[0]
    ksize, proj = queue.shape       # queue stored (QUEUE_SIZE, PROJ)
    # torch asserts queue_size % batch_size == 0; required for wrap-free enqueue
    assert ksize % bsz == 0, (bsz, ksize)

    q_maskf = q_mask.astype(jnp.float32)
    k_maskf = k_mask.astype(jnp.float32)

    def _full(shape):
        nd = len(shape)
        return pl.BlockSpec(shape, lambda i, ptr, _nd=nd: (0,) * _nd)

    grid_spec = pltpu.PrefetchScalarGridSpec(
        num_scalar_prefetch=1,
        grid=(1,),
        in_specs=[
            _full(q_tokens.shape), _full(q_maskf.shape),
            _full(k_tokens.shape), _full(k_maskf.shape),
            _full(params_q["emb"].shape), _full(params_q["w"].shape),
            _full(params_q["b"].shape),
            _full(params_k["emb"].shape), _full(params_k["w"].shape),
            _full(params_k["b"].shape),
            _full(queue.shape),
        ],
        out_specs=(
            _full(params_k["emb"].shape),
            _full(params_k["w"].shape),
            _full(params_k["b"].shape),
            # windowed enqueue: only B rows written, placed at block ptr//BSZ
            pl.BlockSpec((bsz, proj),
                         lambda i, ptr: (jax.lax.div(ptr[0], jnp.int32(bsz)), 0)),
            _full((STATS_ROWS, STATS_COLS)),
        ),
    )

    out_shape = (
        jax.ShapeDtypeStruct(params_k["emb"].shape, jnp.float32),   # emb_k_new
        jax.ShapeDtypeStruct(params_k["w"].shape, jnp.float32),     # w_k_new
        jax.ShapeDtypeStruct(params_k["b"].shape, jnp.float32),     # b_k_new
        jax.ShapeDtypeStruct(queue.shape, jnp.float32),             # queue (in place)
        jax.ShapeDtypeStruct((STATS_ROWS, STATS_COLS), jnp.float32),  # stats
    )

    fused = pl.pallas_call(
        functools.partial(_moco_fused_kernel,
                          momentum=MOMENTUM, temperature=TEMPERATURE,
                          label_smoothing=LABEL_SMOOTH,
                          norm_query=NORM_QUERY, norm_doc=NORM_DOC),
        out_shape=out_shape,
        grid_spec=grid_spec,
        # key-encoder params and the queue are updated in place.
        # NOTE: alias indices count every call arg, the scalar-prefetch ptr
        # included (ptr=0, ..., emb_k=8, w_k=9, b_k=10, queue=11).
        input_output_aliases={8: 0, 9: 1, 10: 2, 11: 3},
        compiler_params=pltpu.CompilerParams(
            dimension_semantics=("arbitrary",)),
    )

    emb_k_new, w_k_new, b_k_new, queue_new, stats = fused(
        queue_ptr,
        q_tokens, q_maskf, k_tokens, k_maskf,
        params_q["emb"], params_q["w"], params_q["b"],
        params_k["emb"], params_k["w"], params_k["b"],
        queue,
    )

    loss = stats[0, 0]
    acc = stats[0, 1]
    stdq = stats[0, 2]
    stdk = stats[0, 3]
    # ptr update is pure scalar glue (one fused XLA op); kept outside the kernel.
    queue_ptr_new = ((queue_ptr + bsz) % ksize).astype(jnp.int32)

    iter_stats = {
        "loss": (loss, bsz),
        "accuracy": (acc, bsz),
        "stdq": (stdq, bsz),
        "stdk": (stdk, bsz),
    }
    new_state = {
        "params_k": {"emb": emb_k_new, "w": w_k_new, "b": b_k_new},
        "queue": queue_new,
        "queue_ptr": queue_ptr_new,
    }
    return (loss, iter_stats), new_state


# ---------------------------------------------------------------------------
# main
# ---------------------------------------------------------------------------
if __name__ == "__main__":
    key = jax.random.PRNGKey(0)
    k1, k2, k3, k4, k5 = jax.random.split(key, 5)

    # deterministic synthetic encoder params; encoder_k is a distinct-buffer copy
    params_q = {
        "emb": 0.02 * jax.random.normal(k1, (VOCAB, HIDDEN), jnp.float32),
        "w": 0.02 * jax.random.normal(k2, (HIDDEN, PROJ), jnp.float32),
        "b": jnp.zeros((1, PROJ), jnp.float32),   # bias kept 2-D (1, P), lane-dense
    }
    params_k = jax.tree_util.tree_map(jnp.copy, params_q)

    # queue buffer stored row-major as (QUEUE_SIZE, PROJ): each row is one key,
    # equivalent to torch's randn(PROJ, QUEUE_SIZE) normalized along dim 0.
    queue = jax.random.normal(k3, (QUEUE_SIZE, PROJ), jnp.float32)
    queue = queue * jax.lax.rsqrt(
        jnp.maximum(jnp.sum(queue * queue, axis=1, keepdims=True), 1e-24))
    queue_ptr = jnp.zeros((1,), jnp.int32)

    q_tokens = jax.random.randint(k4, (BSZ, SEQ), 0, VOCAB, dtype=jnp.int32)
    k_tokens = jax.random.randint(k5, (BSZ, SEQ), 0, VOCAB, dtype=jnp.int32)
    q_mask = jnp.ones((BSZ, SEQ), jnp.int32)
    k_mask = jnp.ones((BSZ, SEQ), jnp.int32)

    (loss, iter_stats), new_state = moco_forward(
        params_q, params_k, queue, queue_ptr,
        q_tokens, q_mask, k_tokens, k_mask)

    jax.block_until_ready(loss)
    jax.block_until_ready(new_state["queue"])
    jax.block_until_ready(new_state["params_k"])
    jax.block_until_ready(new_state["queue_ptr"])
    print("KERNEL_OK")
</pallas_src>

<mosaic_0001>
module attributes {stable_mosaic.version = 11 : i64} {
  func.func @_moco_fused_kernel(%arg0: i32, %arg1: memref<1xi32, #tpu.memory_space<smem>>, %arg2: memref<8x8xi32, #tpu.memory_space<vmem>>, %arg3: memref<8x8xf32, #tpu.memory_space<vmem>>, %arg4: memref<8x8xi32, #tpu.memory_space<vmem>>, %arg5: memref<8x8xf32, #tpu.memory_space<vmem>>, %arg6: memref<128x128xf32, #tpu.memory_space<vmem>>, %arg7: memref<128x128xf32, #tpu.memory_space<vmem>>, %arg8: memref<1x128xf32, #tpu.memory_space<vmem>>, %arg9: memref<128x128xf32, #tpu.memory_space<vmem>>, %arg10: memref<128x128xf32, #tpu.memory_space<vmem>>, %arg11: memref<1x128xf32, #tpu.memory_space<vmem>>, %arg12: memref<128x128xf32, #tpu.memory_space<vmem>>, %arg13: memref<128x128xf32, #tpu.memory_space<vmem>>, %arg14: memref<128x128xf32, #tpu.memory_space<vmem>>, %arg15: memref<1x128xf32, #tpu.memory_space<vmem>>, %arg16: memref<8x128xf32, #tpu.memory_space<vmem>>, %arg17: memref<8x128xf32, #tpu.memory_space<vmem>>) attributes {dimension_semantics = [#tpu.dimension_semantics<arbitrary>], iteration_bounds = array<i64: 1>, scalar_prefetch = 1 : i64, scratch_operands = 0 : i64, tpu.core_type = #tpu.core_type<tc>, window_params = [{pipeline_mode = #tpu.pipeline_mode<synchronous>, transform_indices = @transform_0, window_bounds = array<i64: 8, 8>}, {pipeline_mode = #tpu.pipeline_mode<synchronous>, transform_indices = @transform_1, window_bounds = array<i64: 8, 8>}, {pipeline_mode = #tpu.pipeline_mode<synchronous>, transform_indices = @transform_2, window_bounds = array<i64: 8, 8>}, {pipeline_mode = #tpu.pipeline_mode<synchronous>, transform_indices = @transform_3, window_bounds = array<i64: 8, 8>}, {pipeline_mode = #tpu.pipeline_mode<synchronous>, transform_indices = @transform_4, window_bounds = array<i64: 128, 128>}, {pipeline_mode = #tpu.pipeline_mode<synchronous>, transform_indices = @transform_5, window_bounds = array<i64: 128, 128>}, {pipeline_mode = #tpu.pipeline_mode<synchronous>, transform_indices = @transform_6, window_bounds = array<i64: 1, 128>}, {pipeline_mode = #tpu.pipeline_mode<synchronous>, transform_indices = @transform_7, window_bounds = array<i64: 128, 128>}, {pipeline_mode = #tpu.pipeline_mode<synchronous>, transform_indices = @transform_8, window_bounds = array<i64: 128, 128>}, {pipeline_mode = #tpu.pipeline_mode<synchronous>, transform_indices = @transform_9, window_bounds = array<i64: 1, 128>}, {pipeline_mode = #tpu.pipeline_mode<synchronous>, transform_indices = @transform_10, window_bounds = array<i64: 128, 128>}, {pipeline_mode = #tpu.pipeline_mode<synchronous>, transform_indices = @transform_11, window_bounds = array<i64: 128, 128>}, {pipeline_mode = #tpu.pipeline_mode<synchronous>, transform_indices = @transform_12, window_bounds = array<i64: 128, 128>}, {pipeline_mode = #tpu.pipeline_mode<synchronous>, transform_indices = @transform_13, window_bounds = array<i64: 1, 128>}, {transform_indices = @transform_14, window_bounds = array<i64: 8, 128>}, {pipeline_mode = #tpu.pipeline_mode<synchronous>, transform_indices = @transform_15, window_bounds = array<i64: 8, 128>}]} {
    %c0 = arith.constant 0 : index
    %c0_0 = arith.constant 0 : index
    %0 = vector.load %arg6[%c0, %c0_0] : memref<128x128xf32, #tpu.memory_space<vmem>>, vector<128x128xf32>
    %c0_1 = arith.constant 0 : index
    %c0_2 = arith.constant 0 : index
    %1 = vector.load %arg7[%c0_1, %c0_2] : memref<128x128xf32, #tpu.memory_space<vmem>>, vector<128x128xf32>
    %c0_3 = arith.constant 0 : index
    %c0_4 = arith.constant 0 : index
    %2 = vector.load %arg8[%c0_3, %c0_4] : memref<1x128xf32, #tpu.memory_space<vmem>>, vector<1x128xf32>
    %c0_5 = arith.constant 0 : index
    %c0_6 = arith.constant 0 : index
    %3 = vector.load %arg9[%c0_5, %c0_6] : memref<128x128xf32, #tpu.memory_space<vmem>>, vector<128x128xf32>
    %cst = arith.constant 9.990000e-01 : f32
    %4 = vector.broadcast %cst : f32 to vector<128x128xf32>
    %5 = arith.mulf %3, %4 : vector<128x128xf32>
    %cst_7 = arith.constant 1.000000e-03 : f32
    %6 = vector.broadcast %cst_7 : f32 to vector<128x128xf32>
    %7 = arith.mulf %0, %6 : vector<128x128xf32>
    %8 = arith.addf %5, %7 : vector<128x128xf32>
    %c0_8 = arith.constant 0 : index
    %c0_9 = arith.constant 0 : index
    %9 = vector.load %arg10[%c0_8, %c0_9] : memref<128x128xf32, #tpu.memory_space<vmem>>, vector<128x128xf32>
    %cst_10 = arith.constant 9.990000e-01 : f32
    %10 = vector.broadcast %cst_10 : f32 to vector<128x128xf32>
    %11 = arith.mulf %9, %10 : vector<128x128xf32>
    %cst_11 = arith.constant 1.000000e-03 : f32
    %12 = vector.broadcast %cst_11 : f32 to vector<128x128xf32>
    %13 = arith.mulf %1, %12 : vector<128x128xf32>
    %14 = arith.addf %11, %13 : vector<128x128xf32>
    %c0_12 = arith.constant 0 : index
    %c0_13 = arith.constant 0 : index
    %15 = vector.load %arg11[%c0_12, %c0_13] : memref<1x128xf32, #tpu.memory_space<vmem>>, vector<1x128xf32>
    %cst_14 = arith.constant 9.990000e-01 : f32
    %16 = vector.broadcast %cst_14 : f32 to vector<1x128xf32>
    %17 = arith.mulf %15, %16 : vector<1x128xf32>
    %cst_15 = arith.constant 1.000000e-03 : f32
    %18 = vector.broadcast %cst_15 : f32 to vector<1x128xf32>
    %19 = arith.mulf %2, %18 : vector<1x128xf32>
    %20 = arith.addf %17, %19 : vector<1x128xf32>
    %c0_16 = arith.constant 0 : index
    %c0_17 = arith.constant 0 : index
    %21 = vector.load %arg13[%c0_16, %c0_17] : memref<128x128xf32, #tpu.memory_space<vmem>>, vector<128x128xf32>
    tpu.vector_store %arg13[%c0_16, %c0_17], %8 {strides = array<i32>} : memref<128x128xf32, #tpu.memory_space<vmem>>, vector<128x128xf32>,
    %c0_18 = arith.constant 0 : index
    %c0_19 = arith.constant 0 : index
    %22 = vector.load %arg14[%c0_18, %c0_19] : memref<128x128xf32, #tpu.memory_space<vmem>>, vector<128x128xf32>
    tpu.vector_store %arg14[%c0_18, %c0_19], %14 {strides = array<i32>} : memref<128x128xf32, #tpu.memory_space<vmem>>, vector<128x128xf32>,
    %c0_20 = arith.constant 0 : index
    %c0_21 = arith.constant 0 : index
    %23 = vector.load %arg15[%c0_20, %c0_21] : memref<1x128xf32, #tpu.memory_space<vmem>>, vector<1x128xf32>
    tpu.vector_store %arg15[%c0_20, %c0_21], %20 {strides = array<i32>} : memref<1x128xf32, #tpu.memory_space<vmem>>, vector<1x128xf32>,
    %c0_22 = arith.constant 0 : index
    %c0_23 = arith.constant 0 : index
    %24 = vector.load %arg2[%c0_22, %c0_23] : memref<8x8xi32, #tpu.memory_space<vmem>>, vector<8x8xi32>
    %c0_24 = arith.constant 0 : index
    %c0_25 = arith.constant 0 : index
    %25 = vector.load %arg3[%c0_24, %c0_25] : memref<8x8xf32, #tpu.memory_space<vmem>>, vector<8x8xf32>
    %26 = vector.shape_cast %24 : vector<8x8xi32> to vector<8x8x1xi32>
    %27 = tpu.iota {dimensions = array<i32: 2>} : vector<8x8x128xi32>
    %28 = vector.broadcast %26 : vector<8x8x1xi32> to vector<8x8x128xi32>
    %29 = arith.cmpi eq, %28, %27 : vector<8x8x128xi32>
    %30 = arith.extui %29 : vector<8x8x128xi1> to vector<8x8x128xi32>
    %31 = arith.sitofp %30 : vector<8x8x128xi32> to vector<8x8x128xf32>
    %32 = vector.shape_cast %25 : vector<8x8xf32> to vector<8x8x1xf32>
    %33 = vector.broadcast %32 : vector<8x8x1xf32> to vector<8x8x128xf32>
    %34 = arith.mulf %31, %33 : vector<8x8x128xf32>
    %cst_26 = arith.constant dense<0.000000e+00> : vector<8x128xf32>
    %35 = vector.multi_reduction <add>, %34, %cst_26 [1] : vector<8x8x128xf32> to vector<8x128xf32>
    %cst_27 = arith.constant dense<0.000000e+00> : vector<8xf32>
    %36 = vector.multi_reduction <add>, %25, %cst_27 [1] : vector<8x8xf32> to vector<8xf32>
    %37 = vector.shape_cast %36 : vector<8xf32> to vector<8x1xf32>
    %cst_28 = arith.constant 1.000000e+00 : f32
    %38 = vector.broadcast %cst_28 : f32 to vector<8x1xf32>
    %39 = arith.maximumf %37, %38 : vector<8x1xf32>
    %40 = arith.truncf %35 : vector<8x128xf32> to vector<8x128xbf16>
    %41 = arith.truncf %0 : vector<128x128xf32> to vector<128x128xbf16>
    %cst_29 = arith.constant dense<0.000000e+00> : vector<8x128xf32>
    %42 = tpu.matmul %40, %41, %cst_29 {dimension_numbers = #tpu.dot_dimension_numbers<[1], [0], [0], [1], [0, 0, 1, 1], [], []>} : vector<8x128xbf16>, vector<128x128xbf16>, vector<8x128xf32> -> vector<8x128xf32>
    %43 = tpu.reciprocal %39 {approx = true} : vector<8x1xf32> -> vector<8x1xf32>
    %44 = vector.broadcast %43 : vector<8x1xf32> to vector<8x128xf32>
    %45 = arith.mulf %42, %44 : vector<8x128xf32>
    %46 = arith.truncf %45 : vector<8x128xf32> to vector<8x128xbf16>
    %47 = arith.truncf %1 : vector<128x128xf32> to vector<128x128xbf16>
    %cst_30 = arith.constant dense<0.000000e+00> : vector<8x128xf32>
    %48 = tpu.matmul %46, %47, %cst_30 {dimension_numbers = #tpu.dot_dimension_numbers<[1], [0], [0], [1], [0, 0, 1, 1], [], []>} : vector<8x128xbf16>, vector<128x128xbf16>, vector<8x128xf32> -> vector<8x128xf32>
    %49 = vector.broadcast %2 : vector<1x128xf32> to vector<8x128xf32>
    %50 = arith.addf %48, %49 : vector<8x128xf32>
    %c0_31 = arith.constant 0 : index
    %c0_32 = arith.constant 0 : index
    %51 = vector.load %arg4[%c0_31, %c0_32] : memref<8x8xi32, #tpu.memory_space<vmem>>, vector<8x8xi32>
    %c0_33 = arith.constant 0 : index
    %c0_34 = arith.constant 0 : index
    %52 = vector.load %arg5[%c0_33, %c0_34] : memref<8x8xf32, #tpu.memory_space<vmem>>, vector<8x8xf32>
    %53 = vector.shape_cast %51 : vector<8x8xi32> to vector<8x8x1xi32>
    %54 = tpu.iota {dimensions = array<i32: 2>} : vector<8x8x128xi32>
    %55 = vector.broadcast %53 : vector<8x8x1xi32> to vector<8x8x128xi32>
    %56 = arith.cmpi eq, %55, %54 : vector<8x8x128xi32>
    %57 = arith.extui %56 : vector<8x8x128xi1> to vector<8x8x128xi32>
    %58 = arith.sitofp %57 : vector<8x8x128xi32> to vector<8x8x128xf32>
    %59 = vector.shape_cast %52 : vector<8x8xf32> to vector<8x8x1xf32>
    %60 = vector.broadcast %59 : vector<8x8x1xf32> to vector<8x8x128xf32>
    %61 = arith.mulf %58, %60 : vector<8x8x128xf32>
    %cst_35 = arith.constant dense<0.000000e+00> : vector<8x128xf32>
    %62 = vector.multi_reduction <add>, %61, %cst_35 [1] : vector<8x8x128xf32> to vector<8x128xf32>
    %cst_36 = arith.constant dense<0.000000e+00> : vector<8xf32>
    %63 = vector.multi_reduction <add>, %52, %cst_36 [1] : vector<8x8xf32> to vector<8xf32>
    %64 = vector.shape_cast %63 : vector<8xf32> to vector<8x1xf32>
    %cst_37 = arith.constant 1.000000e+00 : f32
    %65 = vector.broadcast %cst_37 : f32 to vector<8x1xf32>
    %66 = arith.maximumf %64, %65 : vector<8x1xf32>
    %67 = arith.truncf %62 : vector<8x128xf32> to vector<8x128xbf16>
    %68 = arith.truncf %8 : vector<128x128xf32> to vector<128x128xbf16>
    %cst_38 = arith.constant dense<0.000000e+00> : vector<8x128xf32>
    %69 = tpu.matmul %67, %68, %cst_38 {dimension_numbers = #tpu.dot_dimension_numbers<[1], [0], [0], [1], [0, 0, 1, 1], [], []>} : vector<8x128xbf16>, vector<128x128xbf16>, vector<8x128xf32> -> vector<8x128xf32>
    %70 = tpu.reciprocal %66 {approx = true} : vector<8x1xf32> -> vector<8x1xf32>
    %71 = vector.broadcast %70 : vector<8x1xf32> to vector<8x128xf32>
    %72 = arith.mulf %69, %71 : vector<8x128xf32>
    %73 = arith.truncf %72 : vector<8x128xf32> to vector<8x128xbf16>
    %74 = arith.truncf %14 : vector<128x128xf32> to vector<128x128xbf16>
    %cst_39 = arith.constant dense<0.000000e+00> : vector<8x128xf32>
    %75 = tpu.matmul %73, %74, %cst_39 {dimension_numbers = #tpu.dot_dimension_numbers<[1], [0], [0], [1], [0, 0, 1, 1], [], []>} : vector<8x128xbf16>, vector<128x128xbf16>, vector<8x128xf32> -> vector<8x128xf32>
    %76 = vector.broadcast %20 : vector<1x128xf32> to vector<8x128xf32>
    %77 = arith.addf %75, %76 : vector<8x128xf32>
    %78 = arith.mulf %50, %50 : vector<8x128xf32>
    %cst_40 = arith.constant dense<0.000000e+00> : vector<8xf32>
    %79 = vector.multi_reduction <add>, %78, %cst_40 [1] : vector<8x128xf32> to vector<8xf32>
    %80 = vector.shape_cast %79 : vector<8xf32> to vector<8x1xf32>
    %cst_41 = arith.constant 1.000000e-24 : f32
    %81 = vector.broadcast %cst_41 : f32 to vector<8x1xf32>
    %82 = arith.maximumf %80, %81 : vector<8x1xf32>
    %83 = math.rsqrt %82 : vector<8x1xf32>
    %84 = vector.broadcast %83 : vector<8x1xf32> to vector<8x128xf32>
    %85 = arith.mulf %50, %84 : vector<8x128xf32>
    %86 = arith.mulf %77, %77 : vector<8x128xf32>
    %cst_42 = arith.constant dense<0.000000e+00> : vector<8xf32>
    %87 = vector.multi_reduction <add>, %86, %cst_42 [1] : vector<8x128xf32> to vector<8xf32>
    %88 = vector.shape_cast %87 : vector<8xf32> to vector<8x1xf32>
    %cst_43 = arith.constant 1.000000e-24 : f32
    %89 = vector.broadcast %cst_43 : f32 to vector<8x1xf32>
    %90 = arith.maximumf %88, %89 : vector<8x1xf32>
    %91 = math.rsqrt %90 : vector<8x1xf32>
    %92 = vector.broadcast %91 : vector<8x1xf32> to vector<8x128xf32>
    %93 = arith.mulf %77, %92 : vector<8x128xf32>
    %94 = arith.mulf %85, %93 : vector<8x128xf32>
    %cst_44 = arith.constant dense<0.000000e+00> : vector<8xf32>
    %95 = vector.multi_reduction <add>, %94, %cst_44 [1] : vector<8x128xf32> to vector<8xf32>
    %96 = vector.shape_cast %95 : vector<8xf32> to vector<8x1xf32>
    %cst_45 = arith.constant 2.000000e+01 : f32
    %97 = vector.broadcast %cst_45 : f32 to vector<8x1xf32>
    %98 = arith.mulf %96, %97 : vector<8x1xf32>
    %99 = arith.truncf %85 : vector<8x128xf32> to vector<8x128xbf16>
    %c0_46 = arith.constant 0 : index
    %c0_47 = arith.constant 0 : index
    %100 = vector.load %arg12[%c0_46, %c0_47] : memref<128x128xf32, #tpu.memory_space<vmem>>, vector<128x128xf32>
    %101 = arith.truncf %100 : vector<128x128xf32> to vector<128x128xbf16>
    %cst_48 = arith.constant dense<0.000000e+00> : vector<8x128xf32>
    %102 = tpu.matmul %99, %101, %cst_48 {dimension_numbers = #tpu.dot_dimension_numbers<[1], [1], [0], [0], [0, 0, 1, 0], [], []>} : vector<8x128xbf16>, vector<128x128xbf16>, vector<8x128xf32> -> vector<8x128xf32>
    %cst_49 = arith.constant 2.000000e+01 : f32
    %103 = vector.broadcast %cst_49 : f32 to vector<8x128xf32>
    %104 = arith.mulf %102, %103 : vector<8x128xf32>
    %cst_50 = arith.constant dense<0xFF800000> : vector<8xf32>
    %105 = vector.multi_reduction <maximumf>, %104, %cst_50 [1] : vector<8x128xf32> to vector<8xf32>
    %106 = vector.shape_cast %105 : vector<8xf32> to vector<8x1xf32>
    %107 = arith.maximumf %98, %106 : vector<8x1xf32>
    %108 = arith.subf %98, %107 : vector<8x1xf32>
    %109 = math.exp %108 : vector<8x1xf32>
    %110 = vector.broadcast %107 : vector<8x1xf32> to vector<8x128xf32>
    %111 = arith.subf %104, %110 : vector<8x128xf32>
    %112 = math.exp %111 : vector<8x128xf32>
    %cst_51 = arith.constant dense<0.000000e+00> : vector<8xf32>
    %113 = vector.multi_reduction <add>, %112, %cst_51 [1] : vector<8x128xf32> to vector<8xf32>
    %114 = vector.shape_cast %113 : vector<8xf32> to vector<8x1xf32>
    %115 = arith.addf %109, %114 : vector<8x1xf32>
    %116 = math.log %115 : vector<8x1xf32>
    %117 = arith.addf %116, %107 : vector<8x1xf32>
    %118 = arith.subf %98, %117 : vector<8x1xf32>
    %cst_52 = arith.constant dense<0.000000e+00> : vector<8xf32>
    %119 = vector.multi_reduction <add>, %104, %cst_52 [1] : vector<8x128xf32> to vector<8xf32>
    %120 = vector.shape_cast %119 : vector<8xf32> to vector<8x1xf32>
    %121 = arith.addf %98, %120 : vector<8x1xf32>
    %cst_53 = arith.constant 1.290000e+02 : f32
    %122 = vector.broadcast %cst_53 : f32 to vector<8x1xf32>
    %123 = arith.mulf %122, %117 : vector<8x1xf32>
    %124 = arith.subf %121, %123 : vector<8x1xf32>
    %cst_54 = arith.constant 0.899999976 : f32
    %125 = vector.broadcast %cst_54 : f32 to vector<8x1xf32>
    %126 = arith.mulf %125, %118 : vector<8x1xf32>
    %cst_55 = arith.constant 7.75193795E-4 : f32
    %127 = vector.broadcast %cst_55 : f32 to vector<8x1xf32>
    %128 = arith.mulf %127, %124 : vector<8x1xf32>
    %129 = arith.addf %126, %128 : vector<8x1xf32>
    %cst_56 = arith.constant 0.000000e+00 : f32
    %130 = vector.broadcast %cst_56 : f32 to vector<8x1xf32>
    %131 = arith.subf %130, %129 : vector<8x1xf32>
    %cst_57 = arith.constant dense<0.000000e+00> : vector<1xf32>
    %132 = vector.multi_reduction <add>, %131, %cst_57 [0] : vector<8x1xf32> to vector<1xf32>
    %133 = vector.shape_cast %132 : vector<1xf32> to vector<1x1xf32>
    %cst_58 = arith.constant 8.000000e+00 : f32
    %134 = vector.broadcast %cst_58 : f32 to vector<1x1xf32>
    %135 = arith.divf %133, %134 : vector<1x1xf32>
    %136 = arith.cmpf oge, %98, %106 : vector<8x1xf32>
    %137 = arith.extui %136 : vector<8x1xi1> to vector<8x1xi32>
    %138 = arith.sitofp %137 : vector<8x1xi32> to vector<8x1xf32>
    %cst_59 = arith.constant dense<0.000000e+00> : vector<1xf32>
    %139 = vector.multi_reduction <add>, %138, %cst_59 [0] : vector<8x1xf32> to vector<1xf32>
    %140 = vector.shape_cast %139 : vector<1xf32> to vector<1x1xf32>
    %cst_60 = arith.constant 8.000000e+00 : f32
    %141 = vector.broadcast %cst_60 : f32 to vector<1x1xf32>
    %142 = arith.divf %140, %141 : vector<1x1xf32>
    %cst_61 = arith.constant 1.000000e+02 : f32
    %143 = vector.broadcast %cst_61 : f32 to vector<1x1xf32>
    %144 = arith.mulf %143, %142 : vector<1x1xf32>
    %cst_62 = arith.constant dense<0.000000e+00> : vector<128xf32>
    %145 = vector.multi_reduction <add>, %85, %cst_62 [0] : vector<8x128xf32> to vector<128xf32>
    %146 = vector.shape_cast %145 : vector<128xf32> to vector<1x128xf32>
    %cst_63 = arith.constant 8.000000e+00 : f32
    %147 = vector.broadcast %cst_63 : f32 to vector<1x128xf32>
    %148 = arith.divf %146, %147 : vector<1x128xf32>
    %149 = vector.broadcast %148 : vector<1x128xf32> to vector<8x128xf32>
    %150 = arith.subf %85, %149 : vector<8x128xf32>
    %151 = arith.mulf %150, %150 : vector<8x128xf32>
    %cst_64 = arith.constant dense<0.000000e+00> : vector<128xf32>
    %152 = vector.multi_reduction <add>, %151, %cst_64 [0] : vector<8x128xf32> to vector<128xf32>
    %153 = vector.shape_cast %152 : vector<128xf32> to vector<1x128xf32>
    %cst_65 = arith.constant 7.000000e+00 : f32
    %154 = vector.broadcast %cst_65 : f32 to vector<1x128xf32>
    %155 = arith.divf %153, %154 : vector<1x128xf32>
    %156 = math.sqrt %155 : vector<1x128xf32>
    %cst_66 = arith.constant dense<0.000000e+00> : vector<1xf32>
    %157 = vector.multi_reduction <add>, %156, %cst_66 [1] : vector<1x128xf32> to vector<1xf32>
    %158 = vector.shape_cast %157 : vector<1xf32> to vector<1x1xf32>
    %cst_67 = arith.constant 1.280000e+02 : f32
    %159 = vector.broadcast %cst_67 : f32 to vector<1x1xf32>
    %160 = arith.divf %158, %159 : vector<1x1xf32>
    %cst_68 = arith.constant dense<0.000000e+00> : vector<128xf32>
    %161 = vector.multi_reduction <add>, %93, %cst_68 [0] : vector<8x128xf32> to vector<128xf32>
    %162 = vector.shape_cast %161 : vector<128xf32> to vector<1x128xf32>
    %cst_69 = arith.constant 8.000000e+00 : f32
    %163 = vector.broadcast %cst_69 : f32 to vector<1x128xf32>
    %164 = arith.divf %162, %163 : vector<1x128xf32>
    %165 = vector.broadcast %164 : vector<1x128xf32> to vector<8x128xf32>
    %166 = arith.subf %93, %165 : vector<8x128xf32>
    %167 = arith.mulf %166, %166 : vector<8x128xf32>
    %cst_70 = arith.constant dense<0.000000e+00> : vector<128xf32>
    %168 = vector.multi_reduction <add>, %167, %cst_70 [0] : vector<8x128xf32> to vector<128xf32>
    %169 = vector.shape_cast %168 : vector<128xf32> to vector<1x128xf32>
    %cst_71 = arith.constant 7.000000e+00 : f32
    %170 = vector.broadcast %cst_71 : f32 to vector<1x128xf32>
    %171 = arith.divf %169, %170 : vector<1x128xf32>
    %172 = math.sqrt %171 : vector<1x128xf32>
    %cst_72 = arith.constant dense<0.000000e+00> : vector<1xf32>
    %173 = vector.multi_reduction <add>, %172, %cst_72 [1] : vector<1x128xf32> to vector<1xf32>
    %174 = vector.shape_cast %173 : vector<1xf32> to vector<1x1xf32>
    %cst_73 = arith.constant 1.280000e+02 : f32
    %175 = vector.broadcast %cst_73 : f32 to vector<1x1xf32>
    %176 = arith.divf %174, %175 : vector<1x1xf32>
    %177 = tpu.iota {dimensions = array<i32: 1>} : vector<8x128xi32>
    %c0_i32 = arith.constant 0 : i32
    %178 = vector.broadcast %c0_i32 : i32 to vector<8x128xi32>
    %179 = arith.cmpi eq, %177, %178 : vector<8x128xi32>
    %cst_74 = arith.constant 0.000000e+00 : f32
    %180 = vector.shape_cast %135 : vector<1x1xf32> to vector<1x1xf32>
    %181 = vector.broadcast %180 : vector<1x1xf32> to vector<8x128xf32>
    %182 = vector.broadcast %cst_74 : f32 to vector<8x128xf32>
    %183 = arith.select %179, %181, %182 : vector<8x128xi1>, vector<8x128xf32>
    %c1_i32 = arith.constant 1 : i32
    %184 = vector.broadcast %c1_i32 : i32 to vector<8x128xi32>
    %185 = arith.cmpi eq, %177, %184 : vector<8x128xi32>
    %cst_75 = arith.constant 0.000000e+00 : f32
    %186 = vector.shape_cast %144 : vector<1x1xf32> to vector<1x1xf32>
    %187 = vector.broadcast %186 : vector<1x1xf32> to vector<8x128xf32>
    %188 = vector.broadcast %cst_75 : f32 to vector<8x128xf32>
    %189 = arith.select %185, %187, %188 : vector<8x128xi1>, vector<8x128xf32>
    %190 = arith.addf %183, %189 : vector<8x128xf32>
    %c2_i32 = arith.constant 2 : i32
    %191 = vector.broadcast %c2_i32 : i32 to vector<8x128xi32>
    %192 = arith.cmpi eq, %177, %191 : vector<8x128xi32>
    %cst_76 = arith.constant 0.000000e+00 : f32
    %193 = vector.shape_cast %160 : vector<1x1xf32> to vector<1x1xf32>
    %194 = vector.broadcast %193 : vector<1x1xf32> to vector<8x128xf32>
    %195 = vector.broadcast %cst_76 : f32 to vector<8x128xf32>
    %196 = arith.select %192, %194, %195 : vector<8x128xi1>, vector<8x128xf32>
    %197 = arith.addf %190, %196 : vector<8x128xf32>
    %c3_i32 = arith.constant 3 : i32
    %198 = vector.broadcast %c3_i32 : i32 to vector<8x128xi32>
    %199 = arith.cmpi eq, %177, %198 : vector<8x128xi32>
    %cst_77 = arith.constant 0.000000e+00 : f32
    %200 = vector.shape_cast %176 : vector<1x1xf32> to vector<1x1xf32>
    %201 = vector.broadcast %200 : vector<1x1xf32> to vector<8x128xf32>
    %202 = vector.broadcast %cst_77 : f32 to vector<8x128xf32>
    %203 = arith.select %199, %201, %202 : vector<8x128xi1>, vector<8x128xf32>
    %204 = arith.addf %197, %203 : vector<8x128xf32>
    %c0_78 = arith.constant 0 : index
    %c0_79 = arith.constant 0 : index
    %205 = vector.load %arg17[%c0_78, %c0_79] : memref<8x128xf32, #tpu.memory_space<vmem>>, vector<8x128xf32>
    tpu.vector_store %arg17[%c0_78, %c0_79], %204 {strides = array<i32>} : memref<8x128xf32, #tpu.memory_space<vmem>>, vector<8x128xf32>,
    %c0_80 = arith.constant 0 : index
    %c0_81 = arith.constant 0 : index
    %206 = vector.load %arg16[%c0_80, %c0_81] : memref<8x128xf32, #tpu.memory_space<vmem>>, vector<8x128xf32>
    tpu.vector_store %arg16[%c0_80, %c0_81], %93 {strides = array<i32>} : memref<8x128xf32, #tpu.memory_space<vmem>>, vector<8x128xf32>,
    return
  }
  func.func @transform_0(%arg0: i32, %arg1: memref<1xi32, #tpu.memory_space<smem>>) -> (i32, i32) {
    %c0_i32 = arith.constant 0 : i32
    %c0_i32_0 = arith.constant 0 : i32
    %c0_i32_1 = arith.constant 0 : i32
    return %c0_i32, %c0_i32_0 : i32, i32
  }
  func.func @transform_1(%arg0: i32, %arg1: memref<1xi32, #tpu.memory_space<smem>>) -> (i32, i32) {
    %c0_i32 = arith.constant 0 : i32
    %c0_i32_0 = arith.constant 0 : i32
    %c0_i32_1 = arith.constant 0 : i32
    return %c0_i32, %c0_i32_0 : i32, i32
  }
  func.func @transform_2(%arg0: i32, %arg1: memref<1xi32, #tpu.memory_space<smem>>) -> (i32, i32) {
    %c0_i32 = arith.constant 0 : i32
    %c0_i32_0 = arith.constant 0 : i32
    %c0_i32_1 = arith.constant 0 : i32
    return %c0_i32, %c0_i32_0 : i32, i32
  }
  func.func @transform_3(%arg0: i32, %arg1: memref<1xi32, #tpu.memory_space<smem>>) -> (i32, i32) {
    %c0_i32 = arith.constant 0 : i32
    %c0_i32_0 = arith.constant 0 : i32
    %c0_i32_1 = arith.constant 0 : i32
    return %c0_i32, %c0_i32_0 : i32, i32
  }
  func.func @transform_4(%arg0: i32, %arg1: memref<1xi32, #tpu.memory_space<smem>>) -> (i32, i32) {
    %c0_i32 = arith.constant 0 : i32
    %c0_i32_0 = arith.constant 0 : i32
    %c0_i32_1 = arith.constant 0 : i32
    return %c0_i32, %c0_i32_0 : i32, i32
  }
  func.func @transform_5(%arg0: i32, %arg1: memref<1xi32, #tpu.memory_space<smem>>) -> (i32, i32) {
    %c0_i32 = arith.constant 0 : i32
    %c0_i32_0 = arith.constant 0 : i32
    %c0_i32_1 = arith.constant 0 : i32
    return %c0_i32, %c0_i32_0 : i32, i32
  }
  func.func @transform_6(%arg0: i32, %arg1: memref<1xi32, #tpu.memory_space<smem>>) -> (i32, i32) {
    %c0_i32 = arith.constant 0 : i32
    %c0_i32_0 = arith.constant 0 : i32
    %c0_i32_1 = arith.constant 0 : i32
    return %c0_i32, %c0_i32_0 : i32, i32
  }
  func.func @transform_7(%arg0: i32, %arg1: memref<1xi32, #tpu.memory_space<smem>>) -> (i32, i32) {
    %c0_i32 = arith.constant 0 : i32
    %c0_i32_0 = arith.constant 0 : i32
    %c0_i32_1 = arith.constant 0 : i32
    return %c0_i32, %c0_i32_0 : i32, i32
  }
  func.func @transform_8(%arg0: i32, %arg1: memref<1xi32, #tpu.memory_space<smem>>) -> (i32, i32) {
    %c0_i32 = arith.constant 0 : i32
    %c0_i32_0 = arith.constant 0 : i32
    %c0_i32_1 = arith.constant 0 : i32
    return %c0_i32, %c0_i32_0 : i32, i32
  }
  func.func @transform_9(%arg0: i32, %arg1: memref<1xi32, #tpu.memory_space<smem>>) -> (i32, i32) {
    %c0_i32 = arith.constant 0 : i32
    %c0_i32_0 = arith.constant 0 : i32
    %c0_i32_1 = arith.constant 0 : i32
    return %c0_i32, %c0_i32_0 : i32, i32
  }
  func.func @transform_10(%arg0: i32, %arg1: memref<1xi32, #tpu.memory_space<smem>>) -> (i32, i32) {
    %c0_i32 = arith.constant 0 : i32
    %c0_i32_0 = arith.constant 0 : i32
    %c0_i32_1 = arith.constant 0 : i32
    return %c0_i32, %c0_i32_0 : i32, i32
  }
  func.func @transform_11(%arg0: i32, %arg1: memref<1xi32, #tpu.memory_space<smem>>) -> (i32, i32) {
    %c0_i32 = arith.constant 0 : i32
    %c0_i32_0 = arith.constant 0 : i32
    %c0_i32_1 = arith.constant 0 : i32
    return %c0_i32, %c0_i32_0 : i32, i32
  }
  func.func @transform_12(%arg0: i32, %arg1: memref<1xi32, #tpu.memory_space<smem>>) -> (i32, i32) {
    %c0_i32 = arith.constant 0 : i32
    %c0_i32_0 = arith.constant 0 : i32
    %c0_i32_1 = arith.constant 0 : i32
    return %c0_i32, %c0_i32_0 : i32, i32
  }
  func.func @transform_13(%arg0: i32, %arg1: memref<1xi32, #tpu.memory_space<smem>>) -> (i32, i32) {
    %c0_i32 = arith.constant 0 : i32
    %c0_i32_0 = arith.constant 0 : i32
    %c0_i32_1 = arith.constant 0 : i32
    return %c0_i32, %c0_i32_0 : i32, i32
  }
  func.func @transform_14(%arg0: i32, %arg1: memref<1xi32, #tpu.memory_space<smem>>) -> (i32, i32) {
    %c0 = arith.constant 0 : index
    %0 = memref.load %arg1[%c0] : memref<1xi32, #tpu.memory_space<smem>>
    %c8_i32 = arith.constant 8 : i32
    %1 = arith.divsi %0, %c8_i32 : i32
    %c0_i32 = arith.constant 0 : i32
    %c0_i32_0 = arith.constant 0 : i32
    return %1, %c0_i32 : i32, i32
  }
  func.func @transform_15(%arg0: i32, %arg1: memref<1xi32, #tpu.memory_space<smem>>) -> (i32, i32) {
    %c0_i32 = arith.constant 0 : i32
    %c0_i32_0 = arith.constant 0 : i32
    %c0_i32_1 = arith.constant 0 : i32
    return %c0_i32, %c0_i32_0 : i32, i32
  }
}

</mosaic_0001>

<bundles_post_ra>
// kernel: tpu_custom_call.1
= control target key start
LH: loop header
LB: loop body
LE: loop exit
PB: predicated region body
PF: predicated region fallthrough
CT: control target
= control target key end

     0   :  { %s2417_s0 = inlined_call_operand.<no memory space> [shape: s32[1], index: 0, kind: input, shape index: {}]   ;;  %s2418_s1 = inlined_call_operand.vmem [shape: s32[8,8], index: 1, kind: input, shape index: {}]   ;;  %s2419_s2 = inlined_call_operand.vmem [shape: f32[8,8], index: 2, kind: input, shape index: {}]   ;;  %s2420_s3 = inlined_call_operand.vmem [shape: s32[8,8], index: 3, kind: input, shape index: {}]   ;;  %s2421_s4 = inlined_call_operand.vmem [shape: f32[8,8], index: 4, kind: input, shape index: {}]   ;;  %s2422_s5 = inlined_call_operand.vmem [shape: f32[128,128], index: 5, kind: input, shape index: {}]   ;;  %s2423_s6 = inlined_call_operand.vmem [shape: f32[128,128], index: 6, kind: input, shape index: {}]   ;;  %s2424_s7 = inlined_call_operand.vmem [shape: f32[1,128], index: 7, kind: input, shape index: {}]   ;;  %s2425_s8 = inlined_call_operand.hbm [shape: f32[128,128], index: 8, kind: input, shape index: {}, may-alias: {8,12}]   ;;  %s2426_s9 = inlined_call_operand.hbm [shape: f32[128,128], index: 9, kind: input, shape index: {}, may-alias: {9,13}]   ;;  %s2427_s10 = inlined_call_operand.hbm [shape: f32[1,128], index: 10, kind: input, shape index: {}, may-alias: {10,14}]   ;;  %s2428_s11 = inlined_call_operand.hbm [shape: f32[128,128], index: 11, kind: input, shape index: {}, may-alias: {11,15}]   ;;  %s2429_s12 = inlined_call_operand.hbm [shape: f32[128,128], index: 12, kind: output, shape index: {0}, may-alias: {8,12}]   ;;  %s2430_s13 = inlined_call_operand.hbm [shape: f32[128,128], index: 13, kind: output, shape index: {1}, may-alias: {9,13}]   ;;  %s2431_s14 = inlined_call_operand.hbm [shape: f32[1,128], index: 14, kind: output, shape index: {2}, may-alias: {10,14}]   ;;  %s2432_s15 = inlined_call_operand.hbm [shape: f32[128,128], index: 15, kind: output, shape index: {3}, may-alias: {11,15}]   ;;  %s2433_s16 = inlined_call_operand.hbm [shape: f32[8,128], index: 16, kind: output, shape index: {4}]  }
   0x1   :  { %2435 = sst [smem:[#allocation25_spill]] %s2417_s0 }
   0x2   :  { %23 = vsyncpa [#allocation5], 0 }
   0x3   :  { %24 = vsyncpa [#allocation8], 0 }
   0x4   :  { %25 = vsyncpa [#allocation11], 0 }
   0x5   :  { %26 = vsyncpa [#allocation6], 0 }
   0x6   :  { %27 = vsyncpa [#allocation14], 0 }
   0x7   :  { %28 = vsyncpa [#allocation17], 0  ;;  %s1675_s21 = smov [#allocation7]   ;;  %s1676_s23 = smov [#allocation4]  }
   0x8   :  { %s60_s22 = sshll.u32 %s1675_s21, 4  ;;  %s48_s24 = sshll.u32 %s1676_s23, 4  ;;  %s61_s22 = int_to_ptr.vmem [resolvable:$true] %s60_s22  ;;  %s1773_s24 = int_to_ptr.vmem [resolvable:$true] %s48_s24 }
   0x9   :  { %s1463_s27 = scalar_lea.hbm %s2426_s9, 2048 }
   0xa   :  { %p1464_p0 = scmp.ne.s32.totalorder %s2426_s9, %s1463_s27  ;;  %p1467_p1 = scmp.lt.u32.totalorder %s1463_s27, %s2426_s9 }
   0xc   :  { %p1469_p2 = pnand %p1467_p1, %p1464_p0 }
   0xe   :  { %1472 = shalt.err (!%p1469_p2)
}
   0xf   :  { %s1473_s17 = scalar_lea.vmem %s61_s22, 2048  ;;  %p1478_p4 = scmp.lt.s32.totalorder %s61_s22, %s61_s22 }
  0x10   :  { %p1474_p3 = scmp.ne.s32.totalorder %s61_s22, %s1473_s17  ;;  %p1479_p5 = scmp.lt.s32.totalorder %s1473_s17, %s1473_s17 }
  0x12   :  { %p1480_p6 = por %p1479_p5, %p1478_p4 }
  0x14   :  { %p1481_p7 = pnand %p1480_p6, %p1474_p3 }
  0x16   :  { %1484 = shalt.err (!%p1481_p7)
}
  0x17   :  { %s1677_s18 = smov 128   ;;  %s1678_s19 = smov 8  }
  0x18   :  { %66 = dma.hbm_to_vmem [thread:$0]  %s2426_s9, 2048, %s61_s22, [#allocation8], %s1677_s18, %s1677_s18, %s1678_s19  }
  0x19   :  { %s1485_s26 = scalar_lea.hbm %s2425_s8, 2048 }
  0x1a   :  { %p1486_p8 = scmp.ne.s32.totalorder %s2425_s8, %s1485_s26  ;;  %p1489_p9 = scmp.lt.u32.totalorder %s1485_s26, %s2425_s8 }
  0x1c   :  { %p1491_p10 = pnand %p1489_p9, %p1486_p8 }
  0x1e   :  { %1494 = shalt.err (!%p1491_p10)
}
  0x1f   :  { %s1495_s0 = scalar_lea.vmem %s1773_s24, 2048  ;;  %p1500_p12 = scmp.lt.s32.totalorder %s1773_s24, %s1773_s24 }
  0x20   :  { %p1496_p11 = scmp.ne.s32.totalorder %s1773_s24, %s1495_s0  ;;  %p1501_p13 = scmp.lt.s32.totalorder %s1495_s0, %s1495_s0 }
  0x22   :  { %p1502_p0 = por %p1501_p13, %p1500_p12 }
  0x24   :  { %p1503_p1 = pnand %p1502_p0, %p1496_p11 }
  0x26   :  { %1506 = shalt.err (!%p1503_p1)
}
  0x27   :  { %54 = dma.hbm_to_vmem [thread:$0]  %s2425_s8, 2048, %s1773_s24, [#allocation5], %s1677_s18, %s1677_s18, %s1678_s19  }
  0x28   :  { %s1679_s17 = smov [#allocation9]   ;;  %s1680_s21 = smov [#allocation10]  }
  0x29   :  { %s73_s20 = sshll.u32 %s1679_s17, 4  ;;  %s82_s23 = sshll.u32 %s1680_s21, 4  ;;  %s74_s20 = int_to_ptr.vmem [resolvable:$true] %s73_s20  ;;  %s1810_s23 = int_to_ptr.vmem [resolvable:$true] %s82_s23 }
  0x2a   :  { %s1507_s27 = scalar_lea.hbm %s2427_s10, 16 }
  0x2b   :  { %p1508_p2 = scmp.ne.s32.totalorder %s2427_s10, %s1507_s27  ;;  %p1511_p3 = scmp.lt.u32.totalorder %s1507_s27, %s2427_s10 }
  0x2d   :  { %p1513_p4 = pnand %p1511_p3, %p1508_p2 }
  0x2f   :  { %1516 = shalt.err (!%p1513_p4)
}
  0x30   :  { %s1517_s8 = scalar_lea.vmem %s74_s20, 16  ;;  %s1521_s24 = scalar_lea.vmem %s74_s20, 32 }
  0x31   :  { %p1518_p5 = scmp.ne.s32.totalorder %s74_s20, %s1517_s8  ;;  %p1522_p6 = scmp.lt.s32.totalorder %s74_s20, %s74_s20 }
  0x32   :  { %p1523_p7 = scmp.lt.s32.totalorder %s1521_s24, %s1517_s8 }
  0x34   :  { %p1524_p8 = por %p1523_p7, %p1522_p6 }
  0x36   :  { %p1525_p9 = pnand %p1524_p8, %p1518_p5 }
  0x38   :  { %1528 = shalt.err (!%p1525_p9)
}
  0x39   :  { %76 = dma.hbm_to_vmem [thread:$0]  %s2427_s10, 16, %s74_s20, [#allocation8]  }
  0x3a   :  { %s1529_s25 = scalar_lea.hbm %s2428_s11, 2048 }
  0x3b   :  { %p1530_p10 = scmp.ne.s32.totalorder %s2428_s11, %s1529_s25  ;;  %p1533_p11 = scmp.lt.u32.totalorder %s1529_s25, %s2428_s11 }
  0x3d   :  { %p1535_p12 = pnand %p1533_p11, %p1530_p10 }
  0x3f   :  { %1538 = shalt.err (!%p1535_p12)
}
  0x40   :  { %s1539_s30 = scalar_lea.vmem %s1810_s23, 2048  ;;  %p1544_p0 = scmp.lt.s32.totalorder %s1810_s23, %s1810_s23 }
  0x41   :  { %p1540_p13 = scmp.ne.s32.totalorder %s1810_s23, %s1539_s30  ;;  %p1545_p1 = scmp.lt.s32.totalorder %s1539_s30, %s1539_s30 }
  0x43   :  { %p1546_p2 = por %p1545_p1, %p1544_p0 }
  0x45   :  { %p1547_p3 = pnand %p1546_p2, %p1540_p13 }
  0x47   :  { %1550 = shalt.err (!%p1547_p3)
}
  0x48   :  { %88 = dma.hbm_to_vmem [thread:$0]  %s2428_s11, 2048, %s1810_s23, [#allocation11], %s1677_s18, %s1677_s18, %s1678_s19  }
  0x49   :  { %1663 = dma.done.wait [#allocation5], 2048  }
  0x4a   :  { %1664 = vsyncadd [#allocation5], 4294965248 }
  0x4b   :  { %1665 = dma.done.wait [#allocation8], 2064  }
  0x4c   :  { %1666 = vsyncadd [#allocation8], 4294965232 }
  0x4d   :  { %1667 = dma.done.wait [#allocation11], 2048  }
  0x4e   :  { %1668 = vsyncadd [#allocation11], 4294965248  ;;  %v309_v0 = vlaneseq  ;;  %v1681_v1 = vmov 0.0   ;;  %v307_v7 = vld [vmem:[%s2418_s1] sm:$0xff]  ;;  %v1881_v17 = vld [vmem:[%s2422_s5 + $0x8] sm:$0xff]  ;;  %vm1682_vm0 = vmmov 0  }
  0x4f   :  { %1332 = vmatprep.subr.bf16.mxu1 %v1681_v1  ;;  %1372 = vmatprep.subr.bf16.mxu0 %v1681_v1  ;;  %v1865_v12 = vld [vmem:[%s2419_s2] sm:$0xff]  ;;  %v1893_v22 = vld [vmem:[%s2422_s5 + $0x10] sm:$0xff]  ;;  %v1898_v23 = vld [vmem:[%s2422_s5 + $0x18] sm:$0xff]  ;;  %vm503_vm1 = vcmask 64512   ;;  %vm540_vm10 = vcmask 1041409   ;;  %vm542_vm12 = vcmask 1042434  }
  0x50   :  { %v310_v2 = vshrl.u32 %v309_v0, 7  ;;  %v1876_v16 = vld [vmem:[%s2422_s5] sm:$0xff]  ;;  %v517_v24 = vpack.c.bf16 %v1898_v23, %v1893_v22  ;;  %v1916_v29 = vld [vmem:[%s2422_s5 + $0x28] sm:$0xff]  ;;  %v1929_v34 = vld [vmem:[%s2422_s5 + $0x30] sm:$0xff]  ;;  %1348 = vmatprep.mubr.msk.bf16.mxu1 %vm1682_vm0, %v1681_v1  ;;  %1388 = vmatprep.mubr.msk.bf16.mxu0 %vm1682_vm0, %v1681_v1  ;;  %vm544_vm13 = vcmask 1043459   ;;  %vm546_vm14 = vcmask 1044484  }
  0x51   :  { %v516_v18 = vpack.c.bf16 %v1881_v17, %v1876_v16  ;;  %v1911_v28 = vld [vmem:[%s2422_s5 + $0x20] sm:$0xff]  ;;  %v1934_v35 = vld [vmem:[%s2422_s5 + $0x38] sm:$0xff]  ;;  %v1950_v40 = vld [vmem:[%s2422_s5 + $0x48] sm:$0xff]  ;;  %vm548_vm15 = vcmask 1045509   ;;  %s1683_s11 = smov [#allocation13]  }
  0x52   :  { %v1847_v3 = vsub.s32 2, %v310_v2  ;;  %v1849_v4 = vsub.s32 0, %v310_v2  ;;  %v1851_v5 = vsub.s32 3, %v310_v2  ;;  %v1853_v6 = vsub.s32 1, %v310_v2  ;;  %v1945_v39 = vld [vmem:[%s2422_s5 + $0x40] sm:$0xff]  ;;  %v1967_v45 = vld [vmem:[%s2422_s5 + $0x50] sm:$0xff] }
  0x53   :  { %v1871_v15 = vsub.s32 4, %v310_v2  ;;  %v1888_v21 = vsub.s32 5, %v310_v2  ;;  %1333 = vmatpush3.bf16.msra.mxu1 %v516_v18  ;;  %v1906_v27 = vsub.s32 6, %v310_v2  ;;  %v518_v30 = vpack.c.bf16 %v1916_v29, %v1911_v28  ;;  %v1962_v44 = vld [vmem:[%s2420_s3] sm:$0xff]  ;;  %v1972_v46 = vld [vmem:[%s2422_s5 + $0x58] sm:$0xff]  ;;  %v1989_v51 = vld [vmem:[%s2422_s5 + $0x68] sm:$0xff] }
  0x54   :  { %v326_v8 = vrot.slane %v307_v7, %v1847_v3  ;;  %v312_v9 = vrot.slane %v307_v7, %v1849_v4  ;;  %v333_v10 = vrot.slane %v307_v7, %v1851_v5  ;;  %v319_v11 = vrot.slane %v307_v7, %v1853_v6  ;;  %1334 = vmatprep.subr.bf16.mxu1 %v1681_v1  ;;  %v1984_v50 = vld [vmem:[%s2422_s5 + $0x60] sm:$0xff]  ;;  %v2000_v54 = vld [vmem:[%s2422_s5 + $0x70] sm:$0xff]  ;;  %v2005_v55 = vld [vmem:[%s2422_s5 + $0x78] sm:$0xff]  ;;  %s2436_s3 = sld [smem:[#allocation25_spill]] }
  0x55   :  { %v401_v13 = vrot.slane %v1865_v12, %v1853_v6  ;;  %v394_v14 = vrot.slane %v1865_v12, %v1849_v4  ;;  %v408_v19 = vrot.slane %v1865_v12, %v1847_v3  ;;  %v340_v20 = vrot.slane %v307_v7, %v1871_v15  ;;  %v2016_v58 = vld [vmem:[%s2421_s4] sm:$0xff]  ;;  %s1199_s4 = sshll.u32 %s1683_s11, 4  ;;  %s1200_s4 = int_to_ptr.vmem [resolvable:$true] %s1199_s4 }
  0x56   :  { %328 = vbcast.lane.b32.xlu1 %v326_v8, 256  ;;  %314 = vbcast.lane.b32.xlu0 %v312_v9, 256  ;;  %v415_v25 = vrot.slane %v1865_v12, %v1851_v5  ;;  %v347_v26 = vrot.slane %v307_v7, %v1888_v21  ;;  %v422_v31 = vrot.slane %v1865_v12, %v1871_v15  ;;  %v1924_v33 = vsub.s32 7, %v310_v2  ;;  %s1551_s1 = scalar_lea.vmem %s1200_s4, 2048  ;;  %p1556_p6 = scmp.lt.s32.totalorder %s1200_s4, %s1200_s4 }
  0x57   :  { %1335 = vmatpush3.bf16.msra.mxu1 %v517_v24  ;;  %v354_v32 = vrot.slane %v307_v7, %v1906_v27  ;;  %v519_v36 = vpack.c.bf16 %v1934_v35, %v1929_v34  ;;  %v429_v37 = vrot.slane %v1865_v12, %v1888_v21  ;;  %v520_v41 = vpack.c.bf16 %v1950_v40, %v1945_v39  ;;  %v144_v24 = vld [vmem:[#allocation4 + $0x10] sm:$0xff]  ;;  %p1552_p5 = scmp.ne.s32.totalorder %s1200_s4, %s1551_s1  ;;  %p1557_p7 = scmp.lt.s32.totalorder %s1551_s1, %s1551_s1 }
  0x58   :  { %1336 = vmatprep.subr.bf16.mxu1 %v1681_v1  ;;  %v361_v38 = vrot.slane %v307_v7, %v1924_v33  ;;  %v443_v42 = vrot.slane %v1865_v12, %v1924_v33  ;;  %v436_v43 = vrot.slane %v1865_v12, %v1906_v27  ;;  %v521_v47 = vpack.c.bf16 %v1972_v46, %v1967_v45 }
  0x59   :  { %v665_v48 = vrot.slane %v1962_v44, %v1853_v6  ;;  %v658_v49 = vrot.slane %v1962_v44, %v1849_v4  ;;  %v522_v52 = vpack.c.bf16 %v1989_v51, %v1984_v50  ;;  %v672_v53 = vrot.slane %v1962_v44, %v1847_v3  ;;  %p1558_p8 = por %p1557_p7, %p1556_p6 }
  0x5a   :  { %335 = vbcast.lane.b32.xlu1 %v333_v10, 256  ;;  %321 = vbcast.lane.b32.xlu0 %v319_v11, 256  ;;  %v523_v56 = vpack.c.bf16 %v2005_v55, %v2000_v54  ;;  %v679_v57 = vrot.slane %v1962_v44, %v1851_v5  ;;  %v738_v59 = vrot.slane %v2016_v58, %v1849_v4  ;;  %v504_v7 = vsel %vm503_vm1, %v1865_v12, 0.0  ;;  %v142_v10 = vld [vmem:[#allocation4] sm:$0xff]  ;;  %v143_v11 = vld [vmem:[#allocation4 + $0x8] sm:$0xff]  ;;  %s1220_s25 = ssub.s32 0, %s2436_s3 }
  0x5b   :  { %1337 = vmatpush3.bf16.msra.mxu1 %v518_v30  ;;  %v745_v60 = vrot.slane %v2016_v58, %v1853_v6  ;;  %v686_v61 = vrot.slane %v1962_v44, %v1871_v15  ;;  %v752_v62 = vrot.slane %v2016_v58, %v1847_v3  ;;  %v693_v63 = vrot.slane %v1962_v44, %v1888_v21  ;;  %s1285_s28 = smin.u32 %s1220_s25, %s2436_s3  ;;  %p1219_p4 = scmp.lt.s32.totalorder %s2436_s3, 0 }
  0x5c   :  { %1338 = vmatprep.subr.bf16.mxu1 %v1681_v1  ;;  %v759_v2 = vrot.slane %v2016_v58, %v1851_v5  ;;  %v700_v6 = vrot.slane %v1962_v44, %v1906_v27  ;;  %v766_v3 = vrot.slane %v2016_v58, %v1871_v15  ;;  %v773_v8 = vrot.slane %v2016_v58, %v1888_v21  ;;  %v145_v21 = vld [vmem:[#allocation4 + $0x18] sm:$0xff]  ;;  %s1222_s10 = sshrl.u32 %s1285_s28, 3  ;;  %p1559_p9 = pnand %p1558_p8, %p1552_p5 }
  0x5d   :  { %v174_v9 = vmul.f32 0.001, %v1876_v16  ;;  %v175_v5 = vmul.f32 0.001, %v1881_v17  ;;  %v780_v12 = vrot.slane %v2016_v58, %v1906_v27  ;;  %v176_v18 = vmul.f32 0.001, %v1893_v22 }
  0x5e   :  { %403 = vbcast.lane.b32.xlu1 %v401_v13, 256  ;;  %396 = vbcast.lane.b32.xlu0 %v394_v14, 256  ;;  %v158_v13 = vmul.f32 0.999, %v142_v10  ;;  %v159_v14 = vmul.f32 0.999, %v143_v11 }
  0x5f   :  { %1339 = vmatpush3.bf16.msra.mxu1 %v519_v36  ;;  %v177_v15 = vmul.f32 0.001, %v1898_v23  ;;  %v160_v17 = vmul.f32 0.999, %v144_v24  ;;  %v178_v27 = vmul.f32 0.001, %v1911_v28 }
  0x60   :  { %1340 = vmatprep.subr.bf16.mxu1 %v1681_v1  ;;  %v179_v30 = vmul.f32 0.001, %v1916_v29  ;;  %v147_v36 = vld [vmem:[#allocation4 + $0x28] sm:$0xff]  ;;  %v180_v28 = vmul.f32 0.001, %v1929_v34  ;;  %s1223_s20 = ssub.s32 0, %s1222_s10 }
  0x61   :  { %v192_v22 = vadd.f32 %v176_v18, %v160_v17  ;;  %v181_v29 = vmul.f32 0.001, %v1934_v35  ;;  %v155_v11 = vld [vmem:[#allocation4 + $0x68] sm:$0xff]  ;;  %v188_v18 = vmul.f32 0.001, %v2000_v54  ;;  %s2438_s20 = smov (!%p1219_p4, %s1223_s20), %s1222_s10 }
  0x62   :  { %410 = vbcast.lane.b32.xlu1 %v408_v19, 256  ;;  %342 = vbcast.lane.b32.xlu0 %v340_v20, 256  ;;  %v190_v19 = vadd.f32 %v174_v9, %v158_v13  ;;  %v191_v20 = vadd.f32 %v175_v5, %v159_v14  ;;  %v186_v9 = vmul.f32 0.001, %v1984_v50  ;;  %v187_v5 = vmul.f32 0.001, %v1989_v51 }
  0x63   :  { %1341 = vmatpush3.bf16.msra.mxu1 %v520_v41  ;;  %276 = vst [vmem:[#allocation12 + $0x10] sm:$0xff] %v192_v22  ;;  %v163_v41 = vmul.f32 0.999, %v147_v36  ;;  %v156_v51 = vld [vmem:[#allocation4 + $0x70] sm:$0xff]  ;;  %s1286_s5 = sshll.u32 %s2438_s20, 7 }
  0x64   :  { %1342 = vmatprep.subr.bf16.mxu1 %v1681_v1  ;;  %274 = vst [vmem:[#allocation12] sm:$0xff] %v190_v19  ;;  %275 = vst [vmem:[#allocation12 + $0x8] sm:$0xff] %v191_v20  ;;  %v859_v16 = vpack.c.bf16 %v191_v20, %v190_v19  ;;  %v157_v20 = vld [vmem:[#allocation4 + $0x78] sm:$0xff]  ;;  %s2338_s8 = scalar_lea.hbm %s2432_s15, %s1286_s5 }
  0x66   :  { %417 = vbcast.lane.b32.xlu1 %v415_v25, 256  ;;  %349 = vbcast.lane.b32.xlu0 %v347_v26, 256  ;;  %v161_v25 = vmul.f32 0.999, %v145_v21  ;;  %v787_v26 = vrot.slane %v2016_v58, %v1924_v33  ;;  %v172_v21 = vmul.f32 0.999, %v156_v51 }
  0x67   :  { %1343 = vmatpush3.bf16.msra.mxu1 %v521_v47  ;;  %1373 = vmatpush3.bf16.msra.mxu0 %v859_v16  ;;  %v173_v16 = vmul.f32 0.999, %v157_v20 }
  0x68   :  { %1344 = vmatprep.subr.bf16.mxu1 %v1681_v1  ;;  %v193_v23 = vadd.f32 %v177_v15, %v161_v25  ;;  %1374 = vmatprep.subr.bf16.mxu0 %v1681_v1  ;;  %v189_v15 = vmul.f32 0.001, %v2005_v55  ;;  %v204_v17 = vadd.f32 %v188_v18, %v172_v21  ;;  %v847_v55 = vsel %vm503_vm1, %v2016_v58, 0.0 }
  0x6a   :  { %424 = vbcast.lane.b32.xlu1 %v422_v31, 256  ;;  %356 = vbcast.lane.b32.xlu0 %v354_v32, 256  ;;  %v707_v31 = vrot.slane %v1962_v44, %v1924_v33  ;;  %v146_v32 = vld [vmem:[#allocation4 + $0x20] sm:$0xff]  ;;  %277 = vst [vmem:[#allocation12 + $0x18] sm:$0xff] %v193_v23  ;;  %v148_v33 = vld [vmem:[#allocation4 + $0x30] sm:$0xff]  ;;  %v149_v44 = vld [vmem:[#allocation4 + $0x38] sm:$0xff]  ;;  %v205_v25 = vadd.f32 %v189_v15, %v173_v16 }
  0x6b   :  { %1345 = vmatpush3.bf16.msra.mxu1 %v522_v52  ;;  %v182_v52 = vmul.f32 0.001, %v1945_v39  ;;  %288 = vst [vmem:[#allocation12 + $0x70] sm:$0xff] %v204_v17 }
  0x6c   :  { %1346 = vmatprep.subr.bf16.mxu1 %v1681_v1  ;;  %289 = vst [vmem:[#allocation12 + $0x78] sm:$0xff] %v205_v25  ;;  %v866_v54 = vpack.c.bf16 %v205_v25, %v204_v17 }
  0x6e   :  { %431 = vbcast.lane.b32.xlu1 %v429_v37, 256  ;;  %363 = vbcast.lane.b32.xlu0 %v361_v38, 256  ;;  %v860_v37 = vpack.c.bf16 %v193_v23, %v192_v22  ;;  %v162_v38 = vmul.f32 0.999, %v146_v32 }
  0x6f   :  { %1347 = vmatpush3.bf16.msra.mxu1 %v523_v56  ;;  %v150_v56 = vld [vmem:[#allocation4 + $0x40] sm:$0xff] }
  0x70   :  { %1352 = vmatprep.subr.bf16.mxu1 %v1681_v1  ;;  %1375 = vmatpush3.bf16.msra.mxu0 %v860_v37 }
  0x71   :  { %1376 = vmatprep.subr.bf16.mxu0 %v1681_v1 }
  0x72   :  { %445 = vbcast.lane.b32.xlu1 %v443_v42, 256  ;;  %438 = vbcast.lane.b32.xlu0 %v436_v43, 256  ;;  %v194_v42 = vadd.f32 %v178_v27, %v162_v38  ;;  %v195_v43 = vadd.f32 %v179_v30, %v163_v41  ;;  %v2074_v30 = vand.u32 127, %v309_v0 }
  0x74   :  { %278 = vst [vmem:[#allocation12 + $0x20] sm:$0xff] %v194_v42  ;;  %279 = vst [vmem:[#allocation12 + $0x28] sm:$0xff] %v195_v43  ;;  %v861_v47 = vpack.c.bf16 %v195_v43, %v194_v42 }
  0x76   :  { %667 = vbcast.lane.b32.xlu1 %v665_v48, 256  ;;  %660 = vbcast.lane.b32.xlu0 %v658_v49, 256  ;;  %v164_v48 = vmul.f32 0.999, %v148_v33  ;;  %v165_v49 = vmul.f32 0.999, %v149_v44 }
  0x77   :  { %1377 = vmatpush3.bf16.msra.mxu0 %v861_v47 }
  0x78   :  { %v196_v34 = vadd.f32 %v180_v28, %v164_v48  ;;  %v197_v35 = vadd.f32 %v181_v29, %v165_v49  ;;  %1378 = vmatprep.subr.bf16.mxu0 %v1681_v1 }
  0x7a   :  { %674 = vbcast.lane.b32.xlu0 %v672_v53, 256  ;;  %v183_v53 = vmul.f32 0.001, %v1950_v40  ;;  %280 = vst [vmem:[#allocation12 + $0x30] sm:$0xff] %v196_v34  ;;  %281 = vst [vmem:[#allocation12 + $0x38] sm:$0xff] %v197_v35  ;;  %v152_v40 = vld [vmem:[#allocation4 + $0x50] sm:$0xff] }
  0x7e   :  { %681 = vbcast.lane.b32.xlu0 %v679_v57, 256  ;;  %v151_v57 = vld [vmem:[#allocation4 + $0x48] sm:$0xff] }
  0x82   :  { %740 = vbcast.lane.b32.xlu0 %v738_v59, 256  ;;  %v862_v59 = vpack.c.bf16 %v197_v35, %v196_v34 }
  0x84   :  { %1379 = vmatpush3.bf16.msra.mxu0 %v862_v59 }
  0x85   :  { %1380 = vmatprep.subr.bf16.mxu0 %v1681_v1 }
  0x86   :  { %747 = vbcast.lane.b32.xlu0 %v745_v60, 256  ;;  %v166_v60 = vmul.f32 0.999, %v150_v56 }
  0x88   :  { %v198_v39 = vadd.f32 %v182_v52, %v166_v60 }
  0x8a   :  { %688 = vbcast.lane.b32.xlu0 %v686_v61, 256  ;;  %v167_v61 = vmul.f32 0.999, %v151_v57  ;;  %282 = vst [vmem:[#allocation12 + $0x40] sm:$0xff] %v198_v39 }
  0x8e   :  { %754 = vbcast.lane.b32.xlu0 %v752_v62, 256  ;;  %v184_v62 = vmul.f32 0.001, %v1967_v45 }
  0x92   :  { %695 = vbcast.lane.b32.xlu0 %v693_v63, 256  ;;  %v185_v63 = vmul.f32 0.001, %v1972_v46  ;;  %v154_v46 = vld [vmem:[#allocation4 + $0x60] sm:$0xff] }
  0x93   :  { %v170_v14 = vmul.f32 0.999, %v154_v46 }
  0x95   :  { %v202_v50 = vadd.f32 %v186_v9, %v170_v14 }
  0x96   :  { %761 = vbcast.lane.b32.xlu0 %v759_v2, 256  ;;  %v199_v2 = vadd.f32 %v183_v53, %v167_v61 }
  0x97   :  { %286 = vst [vmem:[#allocation12 + $0x60] sm:$0xff] %v202_v50 }
  0x98   :  { %283 = vst [vmem:[#allocation12 + $0x48] sm:$0xff] %v199_v2 }
  0x9a   :  { %505 = vadd.xlane.f32.xlu1 %v504_v7  ;;  %702 = vbcast.lane.b32.xlu0 %v700_v6, 256  ;;  %v153_v6 = vld [vmem:[#allocation4 + $0x58] sm:$0xff]  ;;  %v863_v7 = vpack.c.bf16 %v199_v2, %v198_v39 }
  0x9c   :  { %1381 = vmatpush3.bf16.msra.mxu0 %v863_v7 }
  0x9d   :  { %1382 = vmatprep.subr.bf16.mxu0 %v1681_v1 }
  0x9e   :  { %768 = vbcast.lane.b32.xlu0 %v766_v3, 256  ;;  %v168_v3 = vmul.f32 0.999, %v152_v40 }
  0xa0   :  { %v200_v45 = vadd.f32 %v184_v62, %v168_v3 }
  0xa2   :  { %775 = vbcast.lane.b32.xlu0 %v773_v8, 256  ;;  %v169_v8 = vmul.f32 0.999, %v153_v6  ;;  %284 = vst [vmem:[#allocation12 + $0x50] sm:$0xff] %v200_v45 }
  0xa4   :  { %v201_v10 = vadd.f32 %v185_v63, %v169_v8 }
  0xa6   :  { %782 = vbcast.lane.b32.xlu0 %v780_v12, 256  ;;  %285 = vst [vmem:[#allocation12 + $0x58] sm:$0xff] %v201_v10  ;;  %v864_v13 = vpack.c.bf16 %v201_v10, %v200_v45  ;;  %v171_v12 = vmul.f32 0.999, %v155_v11 }
  0xa8   :  { %1383 = vmatpush3.bf16.msra.mxu0 %v864_v13  ;;  %v203_v19 = vadd.f32 %v187_v5, %v171_v12 }
  0xa9   :  { %1384 = vmatprep.subr.bf16.mxu0 %v1681_v1 }
  0xaa   :  { %789 = vbcast.lane.b32.xlu0 %v787_v26, 256  ;;  %287 = vst [vmem:[#allocation12 + $0x68] sm:$0xff] %v203_v19  ;;  %v865_v24 = vpack.c.bf16 %v203_v19, %v202_v50 }
  0xab   :  { %709 = vbcast.lane.b32.xlu1 %v707_v31, 256 }
  0xac   :  { %1385 = vmatpush3.bf16.msra.mxu0 %v865_v24 }
  0xad   :  { %1386 = vmatprep.subr.bf16.mxu0 %v1681_v1 }
  0xb0   :  { %1387 = vmatpush3.bf16.msra.mxu0 %v866_v54 }
  0xb1   :  { %1412 = vmatprep.subr.bf16.mxu0 %v1681_v1 }
  0xc8   :  { %v329_v26 = vpop.permute.xlu1 %328  ;;  %v315_v27 = vpop.permute.xlu0 %314 }
  0xc9   :  { %848 = vadd.xlane.f32.xlu0 %v847_v55  ;;  %vm367_vm2 = vcmp.eq.s32.totalorder %v315_v27, %v2074_v30  ;;  %vm369_vm4 = vcmp.eq.s32.totalorder %v329_v26, %v2074_v30 }
  0xca   :  { %v1268_v36 = vsel %vm367_vm2, 1.0, %v1681_v1  ;;  %v1270_v28 = vsel %vm369_vm4, 1.0, %v1681_v1  ;;  %vm550_vm2 = vcmask 1046534  }
  0xcc   :  { %v336_v22 = vpop.permute.xlu1 %335  ;;  %v322_v23 = vpop.permute.xlu0 %321 }
  0xcd   :  { %vm368_vm3 = vcmp.eq.s32.totalorder %v322_v23, %v2074_v30  ;;  %vm370_vm5 = vcmp.eq.s32.totalorder %v336_v22, %v2074_v30 }
  0xce   :  { %v1269_v32 = vsel %vm368_vm3, 1.0, %v1681_v1  ;;  %v1271_v48 = vsel %vm370_vm5, 1.0, %v1681_v1  ;;  %vm552_vm3 = vcmask 1047559  }
  0xd0   :  { %v404_v31 = vpop.permute.xlu1 %403  ;;  %v397_v37 = vpop.permute.xlu0 %396 }
  0xd1   :  { %v448_v58 = vmul.f32 %v1269_v32, %v404_v31  ;;  %v447_v38 = vmul.f32 %v1268_v36, %v397_v37 }
  0xd3   :  { %v461_v41 = vrot.slane %v448_v58, 4  ;;  %v455_v0 = vrot.slane %v447_v38, 4 }
  0xd4   :  { %v411_v29 = vpop.permute.xlu1 %410  ;;  %v343_v42 = vpop.permute.xlu0 %342 }
  0xd5   :  { %v462_v43 = vadd.f32 %v461_v41, %v448_v58  ;;  %v449_v33 = vmul.f32 %v1270_v28, %v411_v29  ;;  %v456_v44 = vadd.f32 %v455_v0, %v447_v38  ;;  %vm371_vm6 = vcmp.eq.s32.totalorder %v343_v42, %v2074_v30 }
  0xd6   :  { %v1272_v39 = vsel %vm371_vm6, 1.0, %v1681_v1 }
  0xd7   :  { %v467_v47 = vrot.slane %v449_v33, 4  ;;  %v463_v53 = vrot.slane %v462_v43, 2  ;;  %v457_v56 = vrot.slane %v456_v44, 2 }
  0xd8   :  { %v418_v49 = vpop.permute.xlu1 %417  ;;  %v350_v52 = vpop.permute.xlu0 %349 }
  0xd9   :  { %v468_v34 = vadd.f32 %v467_v47, %v449_v33  ;;  %v450_v35 = vmul.f32 %v1271_v48, %v418_v49  ;;  %v464_v62 = vadd.f32 %v463_v53, %v462_v43  ;;  %v458_v2 = vadd.f32 %v457_v56, %v456_v44 }
  0xda   :  { %vm372_vm7 = vcmp.eq.s32.totalorder %v350_v52, %v2074_v30 }
  0xdb   :  { %v469_v57 = vrot.slane %v468_v34, 2  ;;  %v473_v59 = vrot.slane %v450_v35, 4  ;;  %v465_v5 = vrot.slane %v464_v62, 1  ;;  %v1273_v10 = vsel %vm372_vm7, 1.0, %v1681_v1 }
  0xdc   :  { %v425_v60 = vpop.permute.xlu1 %424  ;;  %v357_v61 = vpop.permute.xlu0 %356  ;;  %v459_v46 = vrot.slane %v458_v2, 1 }
  0xdd   :  { %v474_v63 = vadd.f32 %v473_v59, %v450_v35  ;;  %v451_v40 = vmul.f32 %v1272_v39, %v425_v60  ;;  %v470_v6 = vadd.f32 %v469_v57, %v468_v34  ;;  %vm373_vm8 = vcmp.eq.s32.totalorder %v357_v61, %v2074_v30 }
  0xde   :  { %v1274_v12 = vsel %vm373_vm8, 1.0, %v1681_v1  ;;  %v466_v16 = vadd.f32 %v465_v5, %v464_v62  ;;  %v460_v17 = vadd.f32 %v459_v46, %v458_v2 }
  0xdf   :  { %v475_v7 = vrot.slane %v474_v63, 2  ;;  %v479_v3 = vrot.slane %v451_v40, 4  ;;  %v471_v14 = vrot.slane %v470_v6, 1 }
  0xe0   :  { %v432_v8 = vpop.permute.xlu1 %431  ;;  %v364_v9 = vpop.permute.xlu0 %363  ;;  %v509_v58 = vpack.c.bf16 %v466_v16, %v466_v16  ;;  %v508_v38 = vpack.c.bf16 %v460_v17, %v460_v17 }
  0xe1   :  { %v476_v45 = vadd.f32 %v475_v7, %v474_v63  ;;  %v480_v11 = vadd.f32 %v479_v3, %v451_v40  ;;  %v452_v13 = vmul.f32 %v1273_v10, %v432_v8  ;;  %vm374_vm9 = vcmp.eq.s32.totalorder %v364_v9, %v2074_v30 }
  0xe2   :  { %v1275_v51 = vsel %vm374_vm9, 1.0, %v1681_v1  ;;  %v472_v55 = vadd.f32 %v471_v14, %v470_v6  ;;  %v533_v52 = vunpack.c.l.b16 %v509_v58  ;;  %v532_v53 = vunpack.c.l.b16 %v508_v38  ;;  %v2106_v14 = vld [vmem:[%s2423_s6] sm:$0xff] }
  0xe3   :  { %v477_v18 = vrot.slane %v476_v45, 1  ;;  %v481_v15 = vrot.slane %v480_v11, 2  ;;  %v485_v50 = vrot.slane %v452_v13, 4 }
  0xe4   :  { %v446_v19 = vpop.permute.xlu1 %445  ;;  %v439_v20 = vpop.permute.xlu0 %438  ;;  %v510_v28 = vpack.c.bf16 %v472_v55, %v472_v55  ;;  %v541_v2 = vsel %vm540_vm10, %v533_v52, %v532_v53 }
  0xe5   :  { %v454_v24 = vmul.f32 %v1275_v51, %v446_v19  ;;  %v453_v21 = vmul.f32 %v1274_v12, %v439_v20  ;;  %v482_v25 = vadd.f32 %v481_v15, %v480_v11  ;;  %v486_v54 = vadd.f32 %v485_v50, %v452_v13  ;;  %v2111_v12 = vld [vmem:[%s2423_s6 + $0x8] sm:$0xff] }
  0xe6   :  { %v478_v22 = vadd.f32 %v477_v18, %v476_v45  ;;  %v534_v35 = vunpack.c.l.b16 %v510_v28 }
  0xe7   :  { %v497_v26 = vrot.slane %v454_v24, 4  ;;  %v491_v27 = vrot.slane %v453_v21, 4  ;;  %v483_v23 = vrot.slane %v482_v25, 1  ;;  %v487_v31 = vrot.slane %v486_v54, 2 }
  0xe8   :  { %v661_v32 = vpop.permute.xlu0 %660  ;;  %v511_v43 = vpack.c.bf16 %v478_v22, %v478_v22  ;;  %v668_v7 = vpop.permute.xlu1 %667  ;;  %v543_v3 = vsel %vm542_vm12, %v534_v35, %v541_v2  ;;  %v2173_v35 = vld [vmem:[%s2423_s6 + $0x48] sm:$0xff]  ;;  %v2182_v2 = vld [vmem:[%s2423_s6 + $0x50] sm:$0xff] }
  0xe9   :  { %v498_v36 = vadd.f32 %v497_v26, %v454_v24  ;;  %v492_v37 = vadd.f32 %v491_v27, %v453_v21  ;;  %v484_v41 = vadd.f32 %v483_v23, %v482_v25  ;;  %v488_v0 = vadd.f32 %v487_v31, %v486_v54  ;;  %v2122_v25 = vld [vmem:[%s2423_s6 + $0x10] sm:$0xff]  ;;  %v2127_v54 = vld [vmem:[%s2423_s6 + $0x18] sm:$0xff] }
  0xea   :  { %vm711_vm11 = vcmp.eq.s32.totalorder %v661_v32, %v2074_v30  ;;  %v535_v59 = vunpack.c.l.b16 %v511_v43  ;;  %vm712_vm1 = vcmp.eq.s32.totalorder %v668_v7, %v2074_v30  ;;  %v599_v24 = vpack.c.bf16 %v2111_v12, %v2106_v14  ;;  %v2139_v32 = vld [vmem:[%s2423_s6 + $0x20] sm:$0xff]  ;;  %v2158_v43 = vld [vmem:[%s2423_s6 + $0x38] sm:$0xff] }
  0xeb   :  { %v499_v29 = vrot.slane %v498_v36, 2  ;;  %v493_v42 = vrot.slane %v492_v37, 2  ;;  %v489_v33 = vrot.slane %v488_v0, 1  ;;  %v512_v47 = vpack.c.bf16 %v484_v41, %v484_v41 }
  0xec   :  { %v2092_v44 = vpop.permute.xlu0 %674  ;;  %v1276_v6 = vsel %vm711_vm11, 1.0, %v1681_v1  ;;  %v545_v5 = vsel %vm544_vm13, %v535_v59, %v543_v3  ;;  %v1277_v15 = vsel %vm712_vm1, 1.0, %v1681_v1  ;;  %v600_v22 = vpack.c.bf16 %v2127_v54, %v2122_v25 }
  0xed   :  { %v500_v48 = vadd.f32 %v499_v29, %v498_v36  ;;  %v494_v49 = vadd.f32 %v493_v42, %v492_v37  ;;  %v490_v34 = vadd.f32 %v489_v33, %v488_v0  ;;  %v536_v62 = vunpack.c.l.b16 %v512_v47  ;;  %v2144_v36 = vld [vmem:[%s2423_s6 + $0x28] sm:$0xff]  ;;  %v2153_v42 = vld [vmem:[%s2423_s6 + $0x30] sm:$0xff] }
  0xee   :  { %vm713_vm4 = vcmp.eq.s32.totalorder %v2092_v44, %v2074_v30  ;;  %v601_v0 = vpack.c.bf16 %v2144_v36, %v2139_v32 }
  0xef   :  { %v501_v56 = vrot.slane %v500_v48, 1  ;;  %v495_v57 = vrot.slane %v494_v49, 1  ;;  %v513_v60 = vpack.c.bf16 %v490_v34, %v490_v34  ;;  %v547_v11 = vsel %vm546_vm14, %v536_v62, %v545_v5  ;;  %v2168_v34 = vld [vmem:[%s2423_s6 + $0x40] sm:$0xff] }
  0xf0   :  { %v2095_v61 = vpop.permute.xlu0 %681  ;;  %v1278_v37 = vsel %vm713_vm4, 1.0, %v1681_v1  ;;  %v603_v62 = vpack.c.bf16 %v2173_v35, %v2168_v34 }
  0xf1   :  { %v502_v63 = vadd.f32 %v501_v56, %v500_v48  ;;  %v496_v39 = vadd.f32 %v495_v57, %v494_v49  ;;  %v537_v40 = vunpack.c.l.b16 %v513_v60  ;;  %vm714_vm5 = vcmp.eq.s32.totalorder %v2095_v61, %v2074_v30 }
  0xf2   :  { %v602_v49 = vpack.c.bf16 %v2158_v43, %v2153_v42  ;;  %v1279_v56 = vsel %vm714_vm5, 1.0, %v1681_v1 }
  0xf3   :  { %v515_v8 = vpack.c.bf16 %v502_v63, %v502_v63  ;;  %v514_v9 = vpack.c.bf16 %v496_v39, %v496_v39  ;;  %v549_v18 = vsel %vm548_vm15, %v537_v40, %v547_v11  ;;  %v2187_v40 = vld [vmem:[%s2423_s6 + $0x58] sm:$0xff]  ;;  %v2201_v11 = vld [vmem:[%s2423_s6 + $0x68] sm:$0xff] }
  0xf4   :  { %v741_v45 = vpop.permute.xlu0 %740  ;;  %v604_v5 = vpack.c.bf16 %v2187_v40, %v2182_v2 }
  0xf5   :  { %v539_v10 = vunpack.c.l.b16 %v515_v8  ;;  %v538_v46 = vunpack.c.l.b16 %v514_v9  ;;  %v791_v13 = vmul.f32 %v1276_v6, %v741_v45 }
  0xf7   :  { %v551_v50 = vsel %vm550_vm2, %v538_v46, %v549_v18  ;;  %v799_v19 = vrot.slane %v791_v13, 4  ;;  %v2196_v46 = vld [vmem:[%s2423_s6 + $0x60] sm:$0xff] }
  0xf8   :  { %v553_v51 = vsel %vm552_vm3, %v539_v10, %v551_v50  ;;  %v748_v20 = vpop.permute.xlu0 %747 }
  0xf9   :  { %v554_v21 = vpack.c.b16 %v553_v51, %v553_v51  ;;  %v800_v16 = vadd.f32 %v799_v19, %v791_v13  ;;  %v792_v17 = vmul.f32 %v1277_v15, %v748_v20  ;;  %v605_v51 = vpack.c.bf16 %v2201_v11, %v2196_v46 }
  0xfb   :  { %1349 = vmatmul.mubr.bf16.vlgmr.msra.gmra.mrb[0].mxu1 %v554_v21  ;;  %v801_v55 = vrot.slane %v800_v16, 2  ;;  %v805_v26 = vrot.slane %v792_v17, 4 }
  0xfc   :  { %v689_v27 = vpop.permute.xlu0 %688  ;;  %1353 = vmatpush3.bf16.msra.mxu1 %v599_v24  ;;  %1368 = vmatprep.mubr.msk.bf16.mxu1 %vm1682_vm0, %v1681_v1 }
  0xfd   :  { %v802_v23 = vadd.f32 %v801_v55, %v800_v16  ;;  %v806_v31 = vadd.f32 %v805_v26, %v792_v17  ;;  %1354 = vmatprep.subr.bf16.mxu1 %v1681_v1  ;;  %vm715_vm6 = vcmp.eq.s32.totalorder %v689_v27, %v2074_v30 }
  0xfe   :  { %v1280_v13 = vsel %vm715_vm6, 1.0, %v1681_v1 }
  0xff   :  { %v807_v58 = vrot.slane %v806_v31, 2  ;;  %v803_v38 = vrot.slane %v802_v23, 1 }
 0x100   :  { %v755_v41 = vpop.permute.xlu0 %754  ;;  %1355 = vmatpush3.bf16.msra.mxu1 %v600_v22 }
 0x101   :  { %v793_v28 = vmul.f32 %v1278_v37, %v755_v41  ;;  %v808_v29 = vadd.f32 %v807_v58, %v806_v31  ;;  %1356 = vmatprep.subr.bf16.mxu1 %v1681_v1  ;;  %v804_v47 = vadd.f32 %v803_v38, %v802_v23 }
 0x103   :  { %v811_v33 = vrot.slane %v793_v28, 4  ;;  %v809_v44 = vrot.slane %v808_v29, 1  ;;  %v851_v59 = vpack.c.bf16 %v804_v47, %v804_v47 }
 0x104   :  { %v696_v48 = vpop.permute.xlu0 %695  ;;  %1357 = vmatpush3.bf16.msra.mxu1 %v601_v0 }
 0x105   :  { %v812_v52 = vadd.f32 %v811_v33, %v793_v28  ;;  %v810_v53 = vadd.f32 %v809_v44, %v808_v29  ;;  %1358 = vmatprep.subr.bf16.mxu1 %v1681_v1  ;;  %v875_v3 = vunpack.c.l.b16 %v851_v59  ;;  %vm716_vm7 = vcmp.eq.s32.totalorder %v696_v48, %v2074_v30 }
 0x106   :  { %v1281_v16 = vsel %vm716_vm7, 1.0, %v1681_v1 }
 0x107   :  { %v813_v57 = vrot.slane %v812_v52, 2  ;;  %v852_v61 = vpack.c.bf16 %v810_v53, %v810_v53 }
 0x108   :  { %v762_v60 = vpop.permute.xlu0 %761  ;;  %1359 = vmatpush3.bf16.msra.mxu1 %v602_v49 }
 0x109   :  { %v814_v63 = vadd.f32 %v813_v57, %v812_v52  ;;  %v794_v39 = vmul.f32 %v1279_v56, %v762_v60  ;;  %1360 = vmatprep.subr.bf16.mxu1 %v1681_v1  ;;  %v876_v9 = vunpack.c.l.b16 %v852_v61 }
 0x10b   :  { %v815_v6 = vrot.slane %v814_v63, 1  ;;  %v817_v7 = vrot.slane %v794_v39, 4  ;;  %v883_v19 = vsel %vm540_vm10, %v876_v9, %v875_v3 }
 0x10c   :  { %v703_v8 = vpop.permute.xlu0 %702  ;;  %1361 = vmatpush3.bf16.msra.mxu1 %v603_v62 }
 0x10d   :  { %v816_v45 = vadd.f32 %v815_v6, %v814_v63  ;;  %v818_v10 = vadd.f32 %v817_v7, %v794_v39  ;;  %1362 = vmatprep.subr.bf16.mxu1 %v1681_v1  ;;  %vm717_vm8 = vcmp.eq.s32.totalorder %v703_v8, %v2074_v30 }
 0x10e   :  { %v1282_v37 = vsel %vm717_vm8, 1.0, %v1681_v1 }
 0x10f   :  { %v853_v18 = vpack.c.bf16 %v816_v45, %v816_v45  ;;  %v819_v15 = vrot.slane %v818_v10, 2 }
 0x110   :  { %v769_v50 = vpop.permute.xlu0 %768  ;;  %1363 = vmatpush3.bf16.msra.mxu1 %v604_v5 }
 0x111   :  { %v877_v20 = vunpack.c.l.b16 %v853_v18  ;;  %v820_v24 = vadd.f32 %v819_v15, %v818_v10  ;;  %v795_v21 = vmul.f32 %v1280_v13, %v769_v50  ;;  %1364 = vmatprep.subr.bf16.mxu1 %v1681_v1 }
 0x113   :  { %v821_v17 = vrot.slane %v820_v24, 1  ;;  %v823_v55 = vrot.slane %v795_v21, 4  ;;  %v884_v26 = vsel %vm542_vm12, %v877_v20, %v883_v19 }
 0x114   :  { %v776_v27 = vpop.permute.xlu0 %775  ;;  %1365 = vmatpush3.bf16.msra.mxu1 %v605_v51 }
 0x115   :  { %v822_v22 = vadd.f32 %v821_v17, %v820_v24  ;;  %v824_v23 = vadd.f32 %v823_v55, %v795_v21  ;;  %v796_v31 = vmul.f32 %v1281_v16, %v776_v27  ;;  %1366 = vmatprep.subr.bf16.mxu1 %v1681_v1 }
 0x117   :  { %v854_v58 = vpack.c.bf16 %v822_v22, %v822_v22  ;;  %v825_v38 = vrot.slane %v824_v23, 2  ;;  %v829_v41 = vrot.slane %v796_v31, 4 }
 0x118   :  { %v783_v0 = vpop.permute.xlu0 %782 }
 0x119   :  { %v878_v28 = vunpack.c.l.b16 %v854_v58  ;;  %v826_v29 = vadd.f32 %v825_v38, %v824_v23  ;;  %v830_v33 = vadd.f32 %v829_v41, %v796_v31  ;;  %v797_v44 = vmul.f32 %v1282_v37, %v783_v0  ;;  %v2228_v31 = vld [vmem:[%s2423_s6 + $0x70] sm:$0xff]  ;;  %v2233_v37 = vld [vmem:[%s2423_s6 + $0x78] sm:$0xff] }
 0x11a   :  { %v606_v58 = vpack.c.bf16 %v2233_v37, %v2228_v31  ;;  %v238_v38 = vmul.f32 0.001, %v2106_v14  ;;  %v239_v41 = vmul.f32 0.001, %v2111_v12  ;;  %v240_v0 = vmul.f32 0.001, %v2122_v25 }
 0x11b   :  { %v827_v47 = vrot.slane %v826_v29, 1  ;;  %v831_v48 = vrot.slane %v830_v33, 2  ;;  %v835_v49 = vrot.slane %v797_v44, 4  ;;  %v885_v52 = vsel %vm544_vm13, %v878_v28, %v884_v26  ;;  %v206_v28 = vld [vmem:[#allocation7] sm:$0xff] }
 0x11c   :  { %v790_v15 = vpop.permute.xlu0 %789  ;;  %1367 = vmatpush3.bf16.msra.mxu1 %v606_v58  ;;  %v242_v12 = vmul.f32 0.001, %v2139_v32  ;;  %v243_v25 = vmul.f32 0.001, %v2144_v36 }
 0x11d   :  { %v828_v53 = vadd.f32 %v827_v47, %v826_v29  ;;  %v832_v56 = vadd.f32 %v831_v48, %v830_v33  ;;  %v836_v57 = vadd.f32 %v835_v49, %v797_v44  ;;  %1392 = vmatprep.subr.bf16.mxu1 %v1681_v1  ;;  %v207_v29 = vld [vmem:[#allocation7 + $0x8] sm:$0xff]  ;;  %v241_v33 = vmul.f32 0.001, %v2127_v54  ;;  %v208_v48 = vld [vmem:[#allocation7 + $0x10] sm:$0xff]  ;;  %v209_v49 = vld [vmem:[#allocation7 + $0x18] sm:$0xff] }
 0x11e   :  { %v222_v44 = vmul.f32 0.999, %v206_v28  ;;  %v223_v47 = vmul.f32 0.999, %v207_v29  ;;  %v224_v14 = vmul.f32 0.999, %v208_v48 }
 0x11f   :  { %v855_v59 = vpack.c.bf16 %v828_v53, %v828_v53  ;;  %v833_v60 = vrot.slane %v832_v56, 1  ;;  %v837_v61 = vrot.slane %v836_v57, 2  ;;  %v220_v48 = vld [vmem:[#allocation7 + $0x70] sm:$0xff] }
 0x120   :  { %v2244_v53 = vadd.f32 %v239_v41, %v223_v47  ;;  %v218_v41 = vld [vmem:[#allocation7 + $0x60] sm:$0xff]  ;;  %v252_v47 = vmul.f32 0.001, %v2228_v31 }
 0x121   :  { %v879_v62 = vunpack.c.l.b16 %v855_v59  ;;  %v834_v63 = vadd.f32 %v833_v60, %v832_v56  ;;  %v838_v39 = vadd.f32 %v837_v61, %v836_v57  ;;  %v225_v56 = vmul.f32 0.999, %v209_v49  ;;  %v210_v60 = vld [vmem:[#allocation7 + $0x20] sm:$0xff]  ;;  %v211_v61 = vld [vmem:[#allocation7 + $0x28] sm:$0xff] }
 0x122   :  { %291 = vst [vmem:[#allocation13 + $0x8] sm:$0xff] %v2244_v53  ;;  %v2252_v57 = vadd.f32 %v240_v0, %v224_v14  ;;  %v226_v36 = vmul.f32 0.999, %v210_v60  ;;  %v219_v0 = vld [vmem:[#allocation7 + $0x68] sm:$0xff]  ;;  %v236_v49 = vmul.f32 0.999, %v220_v48 }
 0x123   :  { %v856_v6 = vpack.c.bf16 %v834_v63, %v834_v63  ;;  %v839_v7 = vrot.slane %v838_v39, 1  ;;  %v886_v3 = vsel %vm546_vm14, %v879_v62, %v885_v52  ;;  %v2242_v52 = vadd.f32 %v238_v38, %v222_v44 }
 0x124   :  { %v2254_v59 = vadd.f32 %v241_v33, %v225_v56  ;;  %292 = vst [vmem:[#allocation13 + $0x10] sm:$0xff] %v2252_v57  ;;  %v227_v62 = vmul.f32 0.999, %v211_v61  ;;  %v244_v63 = vmul.f32 0.001, %v2153_v42  ;;  %v268_v56 = vadd.f32 %v252_v47, %v236_v49 }
 0x125   :  { %v880_v8 = vunpack.c.l.b16 %v856_v6  ;;  %v840_v9 = vadd.f32 %v839_v7, %v838_v39  ;;  %290 = vst [vmem:[#allocation13] sm:$0xff] %v2242_v52  ;;  %v935_v54 = vpack.c.bf16 %v2244_v53, %v2242_v52  ;;  %v245_v39 = vmul.f32 0.001, %v2158_v43 }
 0x126   :  { %293 = vst [vmem:[#allocation13 + $0x18] sm:$0xff] %v2254_v59  ;;  %v936_v32 = vpack.c.bf16 %v2254_v59, %v2252_v57  ;;  %v2262_v6 = vadd.f32 %v242_v12, %v226_v36  ;;  %v2264_v7 = vadd.f32 %v243_v25, %v227_v62  ;;  %v247_v42 = vmul.f32 0.001, %v2173_v35  ;;  %304 = vst [vmem:[#allocation13 + $0x70] sm:$0xff] %v268_v56 }
 0x127   :  { %v2216_v5 = vpop.xlane.xlu1 %505  ;;  %v857_v45 = vpack.c.bf16 %v840_v9, %v840_v9  ;;  %v887_v10 = vsel %vm548_vm15, %v880_v8, %v886_v3  ;;  %v212_v3 = vld [vmem:[#allocation7 + $0x30] sm:$0xff]  ;;  %v213_v8 = vld [vmem:[#allocation7 + $0x38] sm:$0xff]  ;;  %v235_v28 = vmul.f32 0.999, %v219_v0 }
 0x128   :  { %294 = vst [vmem:[#allocation13 + $0x20] sm:$0xff] %v2262_v6  ;;  %295 = vst [vmem:[#allocation13 + $0x28] sm:$0xff] %v2264_v7  ;;  %v937_v9 = vpack.c.bf16 %v2264_v7, %v2262_v6  ;;  %v507_v60 = vmax.f32 %v2216_v5, 1.0  ;;  %v141_v7 = vld [vmem:[%s2424_s7] sm:$0x1] }
 0x129   :  { %v881_v13 = vunpack.c.l.b16 %v857_v45  ;;  %v228_v45 = vmul.f32 0.999, %v212_v3 }
 0x12a   :  { %1445 = vrcp.f32 %v507_v60 }
 0x12b   :  { %v710_v18 = vpop.permute.xlu1 %709  ;;  %v888_v50 = vsel %vm550_vm2, %v881_v13, %v887_v10  ;;  %v229_v10 = vmul.f32 0.999, %v213_v8  ;;  %v246_v13 = vmul.f32 0.001, %v2168_v34  ;;  %v2272_v43 = vadd.f32 %v244_v63, %v228_v45 }
 0x12c   :  { %vm718_vm9 = vcmp.eq.s32.totalorder %v710_v18, %v2074_v30  ;;  %v249_v34 = vmul.f32 0.001, %v2187_v40  ;;  %v234_v40 = vmul.f32 0.999, %v218_v41  ;;  %v272_v8 = vmul.f32 0.001, %v141_v7 }
 0x12d   :  { %v1283_v19 = vsel %vm718_vm9, 1.0, %v1681_v1  ;;  %v2274_v18 = vadd.f32 %v245_v39, %v229_v10  ;;  %296 = vst [vmem:[#allocation13 + $0x30] sm:$0xff] %v2272_v43 }
 0x12e   :  { %v798_v51 = vmul.f32 %v1283_v19, %v790_v15  ;;  %v214_v15 = vld [vmem:[#allocation7 + $0x40] sm:$0xff] }
 0x12f   :  { %297 = vst [vmem:[#allocation13 + $0x38] sm:$0xff] %v2274_v18  ;;  %v938_v19 = vpack.c.bf16 %v2274_v18, %v2272_v43  ;;  %v1008_v18 = vld [vmem:[#allocation10 + $0x10] sm:$0xff] }
 0x130   :  { %v841_v20 = vrot.slane %v798_v51, 4 }
 0x132   :  { %v842_v24 = vadd.f32 %v841_v20, %v798_v51  ;;  %v230_v51 = vmul.f32 0.999, %v214_v15  ;;  %v1009_v15 = vld [vmem:[#allocation10 + $0x18] sm:$0xff] }
 0x134   :  { %v843_v21 = vrot.slane %v842_v24, 2  ;;  %v262_v35 = vadd.f32 %v246_v13, %v230_v51  ;;  %v1446_v61 = vpop.eup %1445  ;;  %v1006_v13 = vld [vmem:[#allocation10] sm:$0xff]  ;;  %v1011_v51 = vld [vmem:[#allocation10 + $0x28] sm:$0xff] }
 0x136   :  { %v844_v16 = vadd.f32 %v843_v21, %v842_v24  ;;  %v248_v24 = vmul.f32 0.001, %v2182_v2  ;;  %298 = vst [vmem:[#allocation13 + $0x40] sm:$0xff] %v262_v35 }
 0x138   :  { %v845_v17 = vrot.slane %v844_v16, 1 }
 0x13a   :  { %v846_v55 = vadd.f32 %v845_v17, %v844_v16  ;;  %v216_v16 = vld [vmem:[#allocation7 + $0x50] sm:$0xff]  ;;  %v217_v17 = vld [vmem:[#allocation7 + $0x58] sm:$0xff] }
 0x13c   :  { %v858_v26 = vpack.c.bf16 %v846_v55, %v846_v55 }
 0x13e   :  { %v882_v27 = vunpack.c.l.b16 %v858_v26  ;;  %v232_v26 = vmul.f32 0.999, %v216_v16  ;;  %v1015_v16 = vld [vmem:[#allocation10 + $0x48] sm:$0xff] }
 0x140   :  { %v889_v22 = vsel %vm552_vm3, %v882_v27, %v888_v50  ;;  %v215_v50 = vld [vmem:[#allocation7 + $0x48] sm:$0xff]  ;;  %v233_v27 = vmul.f32 0.999, %v217_v17  ;;  %v264_v58 = vadd.f32 %v248_v24, %v232_v26  ;;  %v1012_v24 = vld [vmem:[#allocation10 + $0x30] sm:$0xff]  ;;  %v1017_v26 = vld [vmem:[#allocation10 + $0x58] sm:$0xff] }
 0x141   :  { %v890_v23 = vpack.c.b16 %v889_v22, %v889_v22  ;;  %v231_v20 = vmul.f32 0.999, %v215_v50  ;;  %v250_v22 = vmul.f32 0.001, %v2196_v46  ;;  %v253_v46 = vmul.f32 0.001, %v2233_v37 }
 0x142   :  { %v265_v38 = vadd.f32 %v249_v34, %v233_v27  ;;  %300 = vst [vmem:[#allocation13 + $0x50] sm:$0xff] %v264_v58  ;;  %v1023_v50 = vpack.c.bf16 %v1009_v15, %v1008_v18  ;;  %v1013_v34 = vld [vmem:[#allocation10 + $0x38] sm:$0xff] }
 0x143   :  { %1389 = vmatmul.mubr.bf16.vlgmr.msra.gmra.mrb[0].mxu0 %v890_v23  ;;  %v263_v21 = vadd.f32 %v247_v42, %v231_v20  ;;  %v251_v23 = vmul.f32 0.001, %v2201_v11  ;;  %v266_v29 = vadd.f32 %v250_v22, %v234_v40  ;;  %v221_v11 = vld [vmem:[#allocation7 + $0x78] sm:$0xff]  ;;  %v1007_v42 = vld [vmem:[#allocation10 + $0x8] sm:$0xff]  ;;  %v611_v22 = vrot.slane %v141_v7, %v1849_v4  ;;  %v1018_v40 = vld [vmem:[#allocation10 + $0x60] sm:$0xff] }
 0x144   :  { %1428 = vmatprep.mubr.msk.bf16.mxu0 %vm1682_vm0, %v1681_v1  ;;  %301 = vst [vmem:[#allocation13 + $0x58] sm:$0xff] %v265_v38  ;;  %v940_v2 = vpack.c.bf16 %v265_v38, %v264_v58  ;;  %v237_v14 = vmul.f32 0.999, %v221_v11  ;;  %v1022_v43 = vpack.c.bf16 %v1007_v42, %v1006_v13 }
 0x145   :  { %299 = vst [vmem:[#allocation13 + $0x48] sm:$0xff] %v263_v21  ;;  %v939_v55 = vpack.c.bf16 %v263_v21, %v262_v35  ;;  %v267_v33 = vadd.f32 %v251_v23, %v235_v28  ;;  %302 = vst [vmem:[#allocation13 + $0x60] sm:$0xff] %v266_v29  ;;  %v1025_v35 = vpack.c.bf16 %v1013_v34, %v1012_v24  ;;  %v1014_v21 = vld [vmem:[#allocation10 + $0x40] sm:$0xff]  ;;  %v1019_v28 = vld [vmem:[#allocation10 + $0x68] sm:$0xff] }
 0x146   :  { %v269_v12 = vadd.f32 %v253_v46, %v237_v14  ;;  %1413 = vmatpush3.bf16.xpose.msra.mxu0 %v1022_v43  ;;  %v1026_v17 = vpack.c.bf16 %v1015_v16, %v1014_v21 }
 0x147   :  { %303 = vst [vmem:[#allocation13 + $0x68] sm:$0xff] %v267_v33  ;;  %v941_v44 = vpack.c.bf16 %v267_v33, %v266_v29  ;;  %1414 = vmatprep.subr.bf16.mxu0 %v1681_v1  ;;  %v1028_v29 = vpack.c.bf16 %v1019_v28, %v1018_v40  ;;  %v1020_v33 = vld [vmem:[#allocation10 + $0x70] sm:$0xff] }
 0x148   :  { %305 = vst [vmem:[#allocation13 + $0x78] sm:$0xff] %v269_v12  ;;  %v942_v25 = vpack.c.bf16 %v269_v12, %v268_v56 }
 0x14e   :  { %1415 = vmatpush3.bf16.xpose.msra.mxu0 %v1023_v50 }
 0x14f   :  { %1416 = vmatprep.subr.bf16.mxu0 %v1681_v1 }
 0x156   :  { %v849_v5 = vpop.xlane.xlu0 %848 }
 0x157   :  { %v850_v37 = vmax.f32 %v849_v5, 1.0 }
 0x159   :  { %1447 = vrcp.f32 %v850_v37 }
 0x163   :  { %v1448_v52 = vpop.eup %1447 }
 0x1ce   :  { %v590_v36 = vpop.f32.mrb[0].mxu1 }
 0x1cf   :  { %v597_v62 = vmul.f32 %v1446_v61, %v590_v36  ;;  %v1350_v63 = vpop.f32.mrb[1].mxu1 }
 0x1d0   :  { %v593_v39 = vpop.f32.mrb[2].mxu1 }
 0x1d1   :  { %v598_v31 = vpack.c.bf16 %v597_v62, %v597_v62  ;;  %v1351_v3 = vpop.f32.mrb[3].mxu1 }
 0x1d3   :  { %1369 = vmatmul.mubr.bf16.vlgmr.msra.gmra.mrb[4].mxu1 %v598_v31 }
 0x1d4   :  { %1393 = vmatpush3.bf16.msra.mxu1 %v935_v54  ;;  %1408 = vmatprep.mubr.msk.bf16.mxu1 %vm1682_vm0, %v1681_v1 }
 0x1d5   :  { %1394 = vmatprep.subr.bf16.mxu1 %v1681_v1 }
 0x1d8   :  { %1395 = vmatpush3.bf16.msra.mxu1 %v936_v32 }
 0x1d9   :  { %1396 = vmatprep.subr.bf16.mxu1 %v1681_v1 }
 0x1dc   :  { %1397 = vmatpush3.bf16.msra.mxu1 %v937_v9  ;;  %v270_v9 = vld [vmem:[#allocation9] sm:$0x1] }
 0x1dd   :  { %1398 = vmatprep.subr.bf16.mxu1 %v1681_v1  ;;  %v271_v45 = vmul.f32 0.999, %v270_v9 }
 0x1df   :  { %v273_v10 = vadd.f32 %v272_v8, %v271_v45 }
 0x1e0   :  { %1399 = vmatpush3.bf16.msra.mxu1 %v938_v19  ;;  %v1010_v19 = vld [vmem:[#allocation10 + $0x20] sm:$0xff] }
 0x1e1   :  { %1400 = vmatprep.subr.bf16.mxu1 %v1681_v1  ;;  %306 = vst [vmem:[#allocation15] sm:$0x1] %v273_v10  ;;  %v1024_v20 = vpack.c.bf16 %v1011_v51, %v1010_v19  ;;  %v947_v46 = vrot.slane %v273_v10, %v1849_v4 }
 0x1e3   :  { %1417 = vmatpush3.bf16.xpose.msra.mxu0 %v1024_v20 }
 0x1e4   :  { %1401 = vmatpush3.bf16.msra.mxu1 %v939_v55  ;;  %1418 = vmatprep.subr.bf16.mxu0 %v1681_v1  ;;  %v1016_v55 = vld [vmem:[#allocation10 + $0x50] sm:$0xff] }
 0x1e5   :  { %1402 = vmatprep.subr.bf16.mxu1 %v1681_v1  ;;  %v1027_v27 = vpack.c.bf16 %v1017_v26, %v1016_v55 }
 0x1e8   :  { %1403 = vmatpush3.bf16.msra.mxu1 %v940_v2 }
 0x1e9   :  { %1404 = vmatprep.subr.bf16.mxu1 %v1681_v1 }
 0x1eb   :  { %1419 = vmatpush3.bf16.xpose.msra.mxu0 %v1025_v35 }
 0x1ec   :  { %1405 = vmatpush3.bf16.msra.mxu1 %v941_v44  ;;  %1420 = vmatprep.subr.bf16.mxu0 %v1681_v1  ;;  %v1021_v44 = vld [vmem:[#allocation10 + $0x78] sm:$0xff] }
 0x1ed   :  { %1406 = vmatprep.subr.bf16.mxu1 %v1681_v1  ;;  %v1029_v47 = vpack.c.bf16 %v1021_v44, %v1020_v33 }
 0x1f0   :  { %1407 = vmatpush3.bf16.msra.mxu1 %v942_v25 }
 0x1f3   :  { %1421 = vmatpush3.bf16.xpose.msra.mxu0 %v1026_v17 }
 0x1f4   :  { %1422 = vmatprep.subr.bf16.mxu0 %v1681_v1 }
 0x1fb   :  { %1423 = vmatpush3.bf16.xpose.msra.mxu0 %v1027_v27 }
 0x1fc   :  { %1424 = vmatprep.subr.bf16.mxu0 %v1681_v1 }
 0x203   :  { %1425 = vmatpush3.bf16.xpose.msra.mxu0 %v1028_v29 }
 0x204   :  { %1426 = vmatprep.subr.bf16.mxu0 %v1681_v1 }
 0x20b   :  { %1427 = vmatpush3.bf16.xpose.msra.mxu0 %v1029_v47 }
 0x216   :  { %v926_v53 = vpop.f32.mrb[0].mxu0 }
 0x217   :  { %v933_v54 = vmul.f32 %v1448_v52, %v926_v53  ;;  %v1390_v57 = vpop.f32.mrb[1].mxu0 }
 0x218   :  { %v929_v59 = vpop.f32.mrb[2].mxu0 }
 0x219   :  { %v934_v32 = vpack.c.bf16 %v933_v54, %v933_v54  ;;  %v1391_v6 = vpop.f32.mrb[3].mxu0 }
 0x21b   :  { %1409 = vmatmul.mubr.bf16.vlgmr.msra.gmra.mrb[8].mxu1 %v934_v32 }
 0x2a6   :  { %v647_v23 = vpop.f32.mrb[4].mxu1 }
 0x2a7   :  { %v648_v58 = vadd.f32 %v647_v23, %v611_v22  ;;  %v1370_v38 = vpop.f32.mrb[5].mxu1 }
 0x2a8   :  { %v650_v41 = vpop.f32.mrb[6].mxu1 }
 0x2a9   :  { %v1371_v0 = vpop.f32.mrb[7].mxu1  ;;  %v989_v2 = vmul.f32 %v648_v58, %v648_v58 }
 0x2ab   :  { %990 = vadd.xlane.f32.xlu1 %v989_v2 }
 0x2ee   :  { %v983_v48 = vpop.f32.mrb[8].mxu1 }
 0x2ef   :  { %v984_v11 = vadd.f32 %v983_v48, %v947_v46  ;;  %v1410_v49 = vpop.f32.mrb[9].mxu1 }
 0x2f0   :  { %v986_v14 = vpop.f32.mrb[10].mxu1 }
 0x2f1   :  { %v995_v56 = vmul.f32 %v984_v11, %v984_v11  ;;  %v1411_v12 = vpop.f32.mrb[11].mxu1 }
 0x2f3   :  { %996 = vadd.xlane.f32.xlu0 %v995_v56 }
 0x338   :  { %v991_v25 = vpop.xlane.xlu1 %990 }
 0x339   :  { %v992_v60 = vmax.f32 %v991_v25, 1e-24 }
 0x33b   :  { %1449 = vrsqrt.f32 %v992_v60 }
 0x345   :  { %v1450_v61 = vpop.eup %1449 }
 0x346   :  { %v994_v36 = vmul.f32 %v1450_v61, %v648_v58 }
 0x348   :  { %v1005_v62 = vpack.c.bf16 %v994_v36, %v994_v36  ;;  %v1115_v21 = vrot.slane %v994_v36, 4 }
 0x34a   :  { %1429 = vmatmul.mubr.bf16.vlgmr.msra.gmra.mrb[4].mxu0 %v1005_v62  ;;  %v1116_v16 = vadd.f32 %v1115_v21, %v994_v36 }
 0x34c   :  { %v1117_v17 = vrot.slane %v1116_v16, 2 }
 0x34e   :  { %v1118_v55 = vadd.f32 %v1117_v17, %v1116_v16 }
 0x350   :  { %v1119_v26 = vrot.slane %v1118_v55, 1 }
 0x352   :  { %v1120_v27 = vadd.f32 %v1119_v26, %v1118_v55 }
 0x354   :  { %v1121_v22 = vmul.f32 0.125, %v1120_v27 }
 0x356   :  { %v1122_v23 = vsub.f32 %v994_v36, %v1121_v22 }
 0x358   :  { %v1123_v58 = vmul.f32 %v1122_v23, %v1122_v23 }
 0x35a   :  { %v1124_v38 = vrot.slane %v1123_v58, 4 }
 0x35c   :  { %v1125_v41 = vadd.f32 %v1124_v38, %v1123_v58 }
 0x35e   :  { %v1126_v0 = vrot.slane %v1125_v41, 2 }
 0x360   :  { %v1127_v2 = vadd.f32 %v1126_v0, %v1125_v41 }
 0x362   :  { %v1128_v40 = vrot.slane %v1127_v2, 1 }
 0x364   :  { %v1129_v28 = vadd.f32 %v1128_v40, %v1127_v2 }
 0x366   :  { %v1131_v33 = vmul.f32 0.14285715, %v1129_v28 }
 0x368   :  { %vm1134_vm11 = vcmp.eq.f32.partialorder %v1131_v33, inf  ;;  %v1137_v25 = vand.u32 2147483648, %v1131_v33  ;;  %vm1136_vm12 = vcmp.eq.f32.partialorder %v1131_v33, 0.0 }
 0x380   :  { %v997_v63 = vpop.xlane.xlu0 %996 }
 0x381   :  { %v998_v39 = vmax.f32 %v997_v63, 1e-24 }
 0x383   :  { %1451 = vrsqrt.f32 %v998_v39 }
 0x38d   :  { %v1452_v31 = vpop.eup %1451 }
 0x38e   :  { %v1000_v3 = vmul.f32 %v1452_v31, %v984_v11 }
 0x390   :  { %1181 = vst [vmem:[#allocation16] sm:$0xff] %v1000_v3  ;;  %v1001_v4 = vmul.f32 %v1000_v3, %v994_v36  ;;  %v1143_v5 = vrot.slane %v1000_v3, 4 }
 0x392   :  { %1002 = vadd.xlane.f32.xlu0 %v1001_v4  ;;  %v1144_v37 = vadd.f32 %v1143_v5, %v1000_v3 }
 0x394   :  { %v1145_v52 = vrot.slane %v1144_v37, 2 }
 0x396   :  { %v1146_v53 = vadd.f32 %v1145_v52, %v1144_v37 }
 0x398   :  { %v1147_v54 = vrot.slane %v1146_v53, 1 }
 0x39a   :  { %v1148_v57 = vadd.f32 %v1147_v54, %v1146_v53 }
 0x39c   :  { %v1149_v59 = vmul.f32 0.125, %v1148_v57 }
 0x39e   :  { %v1150_v32 = vsub.f32 %v1000_v3, %v1149_v59 }
 0x3a0   :  { %v1151_v6 = vmul.f32 %v1150_v32, %v1150_v32 }
 0x3a2   :  { %v1152_v7 = vrot.slane %v1151_v6, 4 }
 0x3a4   :  { %v1153_v8 = vadd.f32 %v1152_v7, %v1151_v6 }
 0x3a6   :  { %v1154_v9 = vrot.slane %v1153_v8, 2 }
 0x3a8   :  { %v1155_v45 = vadd.f32 %v1154_v9, %v1153_v8 }
 0x3aa   :  { %v1156_v10 = vrot.slane %v1155_v45, 1 }
 0x3ac   :  { %v1157_v13 = vadd.f32 %v1156_v10, %v1155_v45 }
 0x3ae   :  { %v1158_v42 = vmul.f32 0.14285715, %v1157_v13 }
 0x3b0   :  { %1453 = vrsqrt.f32 %v1158_v42  ;;  %vm1161_vm0 = vcmp.eq.f32.partialorder %v1158_v42, inf  ;;  %v1164_v34 = vand.u32 2147483648, %v1158_v42  ;;  %vm1163_vm10 = vcmp.eq.f32.partialorder %v1158_v42, 0.0 }
 0x3b1   :  { %1455 = vrsqrt.f32 %v1131_v33 }
 0x3ba   :  { %v1454_v43 = vpop.eup %1453 }
 0x3bb   :  { %v1160_v20 = vmul.f32 %v1454_v43, %v1158_v42  ;;  %v1456_v49 = vpop.eup %1455 }
 0x3bc   :  { %v1133_v14 = vmul.f32 %v1456_v49, %v1131_v33 }
 0x3bd   :  { %v1162_v24 = vsel %vm1161_vm0, %v1158_v42, %v1160_v20 }
 0x3be   :  { %v1165_v35 = vsel %vm1163_vm10, %v1164_v34, %v1162_v24  ;;  %v1135_v12 = vsel %vm1134_vm11, %v1131_v33, %v1133_v14 }
 0x3bf   :  { %v1138_v60 = vsel %vm1136_vm12, %v1137_v25, %v1135_v12 }
 0x41d   :  { %v1064_v18 = vpop.f32.mrb[4].mxu0 }
 0x41e   :  { %v1070_v15 = vmul.f32 20.0, %v1064_v18  ;;  %v1430_v50 = vpop.f32.mrb[5].mxu0 }
 0x41f   :  { %v1067_v19 = vpop.f32.mrb[6].mxu0  ;;  %v1003_v29 = vpop.xlane.xlu0 %1002 }
 0x420   :  { %1071 = vmax.xlane.f32.xlu1 %v1070_v15  ;;  %v1431_v51 = vpop.f32.mrb[7].mxu0  ;;  %v2317_v44 = vmul.f32 20.0, %v1003_v29 }
 0x424   :  { %1087 = vadd.xlane.f32.xlu1 %v1070_v15 }
 0x428   :  { %1166 = vadd.xlane.f32.xlu1 %v1165_v35 }
 0x4ad   :  { %v2319_v47 = vpop.xlane.xlu1 %1071 }
 0x4ae   :  { %v2323_v46 = vmax.f32 %v2317_v44, %v2319_v47 }
 0x4b0   :  { %v1077_v48 = vsub.f32 %v1070_v15, %v2323_v46 }
 0x4b2   :  { %v1078_v11 = vmul.f32 1.442695, %v1077_v48 }
 0x4b4   :  { %1457 = vpow2.f32 %v1078_v11 }
 0x4be   :  { %v1458_v56 = vpop.eup %1457 }
 0x4bf   :  { %1080 = vadd.xlane.f32.xlu0 %v1458_v56 }
 0x4c3   :  { %1139 = vadd.xlane.f32.xlu0 %v1138_v60 }
 0x4c4   :  { %1562 = shalt.err (!%p1559_p9)
}
 0x4c5   :  { %s1563_s22 = scalar_lea.hbm %s2430_s13, 2048 }
 0x4c6   :  { %p1564_p10 = scmp.ne.s32.totalorder %s2430_s13, %s1563_s22  ;;  %p1567_p11 = scmp.lt.u32.totalorder %s1563_s22, %s2430_s13 }
 0x4c8   :  { %p1569_p12 = pnand %p1567_p11, %p1564_p10 }
 0x4ca   :  { %1572 = shalt.err (!%p1569_p12)
}
 0x4cb   :  { %1205 = dma.vmem_to_hbm [thread:$0]  %s1200_s4, 2048, %s2430_s13, [#allocation14], %s1677_s18, %s1677_s18, %s1678_s19  }
 0x4cc   :  { %s1684_s25 = smov [#allocation16]   ;;  %s1685_s27 = smov [#allocation12]  }
 0x4cd   :  { %s1231_s26 = sshll.u32 %s1684_s25, 4  ;;  %s1187_s28 = sshll.u32 %s1685_s27, 4  ;;  %s1232_s26 = int_to_ptr.vmem [resolvable:$true] %s1231_s26  ;;  %s1188_s28 = int_to_ptr.vmem [resolvable:$true] %s1187_s28 }
 0x4ce   :  { %s1573_s29 = scalar_lea.vmem %s1232_s26, 128  ;;  %p1578_p0 = scmp.lt.s32.totalorder %s1232_s26, %s1232_s26 }
 0x4cf   :  { %p1574_p13 = scmp.ne.s32.totalorder %s1232_s26, %s1573_s29  ;;  %p1579_p1 = scmp.lt.s32.totalorder %s1573_s29, %s1573_s29 }
 0x4d1   :  { %p1580_p2 = por %p1579_p1, %p1578_p0 }
 0x4d3   :  { %p1581_p3 = pnand %p1580_p2, %p1574_p13 }
 0x4d5   :  { %1584 = shalt.err (!%p1581_p3)
}
 0x4d6   :  { %s1585_s30 = scalar_lea.hbm %s2338_s8, 128  ;;  %s1587_s20 = scalar_lea.hbm %s2432_s15, 2048 }
 0x4d7   :  { %p1586_p4 = scmp.ne.s32.totalorder %s2338_s8, %s1585_s30  ;;  %p1588_p5 = scmp.lt.u32.totalorder %s2338_s8, %s2432_s15 }
 0x4d8   :  { %p1589_p6 = scmp.lt.u32.totalorder %s1587_s20, %s1585_s30  ;;  %p1591_p8 = scmp.lt.u32.totalorder %s1585_s30, %s2338_s8 }
 0x4da   :  { %p1590_p7 = por %p1589_p6, %p1588_p5 }
 0x4dc   :  { %p1592_p9 = por %p1591_p8, %p1590_p7 }
 0x4de   :  { %p1593_p10 = pnand %p1592_p9, %p1586_p4 }
 0x4e0   :  { %1596 = shalt.err (!%p1593_p10)
}
 0x4e1   :  { %1234 = dma.vmem_to_hbm [thread:$0]  %s1232_s26, 128, %s2338_s8, [#allocation17]  }
 0x4e2   :  { %s1597_s5 = scalar_lea.vmem %s1188_s28, 2048  ;;  %p1602_p12 = scmp.lt.s32.totalorder %s1188_s28, %s1188_s28 }
 0x4e3   :  { %p1598_p11 = scmp.ne.s32.totalorder %s1188_s28, %s1597_s5  ;;  %p1603_p13 = scmp.lt.s32.totalorder %s1597_s5, %s1597_s5 }
 0x4e5   :  { %p1604_p0 = por %p1603_p13, %p1602_p12 }
 0x4e7   :  { %p1605_p1 = pnand %p1604_p0, %p1598_p11 }
 0x4e9   :  { %1608 = shalt.err (!%p1605_p1)
}
 0x4ea   :  { %s1609_s15 = scalar_lea.hbm %s2429_s12, 2048 }
 0x4eb   :  { %p1610_p2 = scmp.ne.s32.totalorder %s2429_s12, %s1609_s15  ;;  %p1613_p3 = scmp.lt.u32.totalorder %s1609_s15, %s2429_s12 }
 0x4ed   :  { %p1615_p4 = pnand %p1613_p3, %p1610_p2 }
 0x4ef   :  { %1618 = shalt.err (!%p1615_p4)
}
 0x4f0   :  { %1193 = dma.vmem_to_hbm [thread:$0]  %s1188_s28, 2048, %s2429_s12, [#allocation6], %s1677_s18, %s1677_s18, %s1678_s19  }
 0x4f1   :  { %s1686_s6 = smov [#allocation15]  }
 0x4f2   :  { %s1212_s17 = sshll.u32 %s1686_s6, 4  ;;  %s1213_s17 = int_to_ptr.vmem [resolvable:$true] %s1212_s17 }
 0x4f3   :  { %s1619_s7 = scalar_lea.vmem %s1213_s17, 16  ;;  %s1623_s21 = scalar_lea.vmem %s1213_s17, 32 }
 0x4f4   :  { %p1620_p5 = scmp.ne.s32.totalorder %s1213_s17, %s1619_s7  ;;  %p1624_p6 = scmp.lt.s32.totalorder %s1213_s17, %s1213_s17 }
 0x4f5   :  { %p1625_p7 = scmp.lt.s32.totalorder %s1623_s21, %s1619_s7 }
 0x4f7   :  { %p1626_p8 = por %p1625_p7, %p1624_p6 }
 0x4f9   :  { %p1627_p9 = pnand %p1626_p8, %p1620_p5 }
 0x4fb   :  { %1630 = shalt.err (!%p1627_p9)
}
 0x4fc   :  { %s1631_s26 = scalar_lea.hbm %s2431_s14, 16 }
 0x4fd   :  { %p1632_p10 = scmp.ne.s32.totalorder %s2431_s14, %s1631_s26  ;;  %p1635_p11 = scmp.lt.u32.totalorder %s1631_s26, %s2431_s14 }
 0x4ff   :  { %p1637_p12 = pnand %p1635_p11, %p1632_p10 }
 0x501   :  { %1640 = shalt.err (!%p1637_p12)
}
 0x502   :  { %1215 = dma.vmem_to_hbm [thread:$0]  %s1213_s17, 16, %s2431_s14, [#allocation14]   ;;  %v1074_v61 = vsub.f32 %v2317_v44, %v2323_v46  ;;  %vm1104_vm13 = vcmp.ge.f32.partialorder %v2317_v44, %v2319_v47  ;;  %v1088_v52 = vpop.xlane.xlu1 %1087  ;;  %vm1169_vm14 = vcmp.eq.s32.totalorder %v2074_v30, 0  ;;  %vm1171_vm15 = vcmp.eq.s32.totalorder %v2074_v30, 1 }
 0x503   :  { %v1284_v31 = vsel %vm1104_vm13, 1.0, %v1681_v1  ;;  %v1089_v57 = vadd.f32 %v1088_v52, %v2317_v44  ;;  %vm1174_vm1 = vcmp.eq.s32.totalorder %v2074_v30, 2  ;;  %vm1177_vm2 = vcmp.eq.s32.totalorder %v2074_v30, 3  ;;  %s1687_s14 = smov [#allocation18]  }
 0x504   :  { %v1075_v36 = vmul.f32 1.442695, %v1074_v61  ;;  %v1107_v3 = vrot.slane %v1284_v31, 4  ;;  %s1241_s30 = sshll.u32 %s1687_s14, 4  ;;  %s1242_s30 = int_to_ptr.vmem [resolvable:$true] %s1241_s30 }
 0x505   :  { %s1641_s10 = scalar_lea.vmem %s1242_s30, 128  ;;  %p1646_p0 = scmp.lt.s32.totalorder %s1242_s30, %s1242_s30 }
 0x506   :  { %1459 = vpow2.f32 %v1075_v36  ;;  %v1108_v5 = vadd.f32 %v1284_v31, %v1107_v3  ;;  %v1167_v34 = vpop.xlane.xlu1 %1166  ;;  %p1642_p13 = scmp.ne.s32.totalorder %s1242_s30, %s1641_s10  ;;  %p1647_p1 = scmp.lt.s32.totalorder %s1641_s10, %s1641_s10 }
 0x507   :  { %v1168_v16 = vmul.f32 0.0078125, %v1167_v34 }
 0x508   :  { %v1109_v54 = vrot.slane %v1108_v5, 2  ;;  %p1648_p2 = por %p1647_p1, %p1646_p0 }
 0x509   :  { %v1178_v23 = vsel %vm1177_vm2, %v1168_v16, 0.0 }
 0x50a   :  { %v1110_v7 = vadd.f32 %v1109_v54, %v1108_v5  ;;  %p1649_p3 = pnand %p1648_p2, %p1642_p13 }
 0x50c   :  { %v1111_v10 = vrot.slane %v1110_v7, 1 }
 0x50e   :  { %v1112_v42 = vadd.f32 %v1111_v10, %v1110_v7 }
 0x510   :  { %v1460_v62 = vpop.eup %1459  ;;  %v1113_v15 = vmul.f32 0.125, %v1112_v42 }
 0x512   :  { %v1114_v20 = vmul.f32 100.0, %v1113_v15 }
 0x514   :  { %v1172_v17 = vsel %vm1171_vm15, %v1114_v20, 0.0 }
 0x54c   :  { %v1081_v63 = vpop.xlane.xlu0 %1080 }
 0x54d   :  { %v1082_v39 = vadd.f32 %v1460_v62, %v1081_v63 }
 0x54f   :  { %1461 = vlog2.f32 %v1082_v39 }
 0x550   :  { %v1140_v51 = vpop.xlane.xlu0 %1139 }
 0x551   :  { %v1142_v21 = vmul.f32 0.0078125, %v1140_v51 }
 0x553   :  { %v1175_v27 = vsel %vm1174_vm1, %v1142_v21, 0.0 }
 0x559   :  { %v1462_v4 = vpop.eup %1461 }
 0x55a   :  { %v1084_v37 = vmul.f32 0.6931472, %v1462_v4 }
 0x55c   :  { %v1085_v53 = vadd.f32 %v1084_v37, %v2323_v46 }
 0x55e   :  { %v1086_v59 = vsub.f32 %v2317_v44, %v1085_v53  ;;  %v1090_v32 = vmul.f32 129.0, %v1085_v53 }
 0x560   :  { %v1091_v6 = vsub.f32 %v1089_v57, %v1090_v32  ;;  %v1092_v8 = vmul.f32 0.9, %v1086_v59 }
 0x562   :  { %v1093_v9 = vmul.f32 0.0007751938, %v1091_v6 }
 0x564   :  { %v1094_v45 = vadd.f32 %v1093_v9, %v1092_v8 }
 0x566   :  { %v1095_v1 = vsub.f32 0.0, %v1094_v45 }
 0x568   :  { %v1096_v13 = vrot.slane %v1095_v1, 4 }
 0x56a   :  { %v1097_v43 = vadd.f32 %v1096_v13, %v1095_v1 }
 0x56c   :  { %v1098_v18 = vrot.slane %v1097_v43, 2 }
 0x56e   :  { %v1099_v50 = vadd.f32 %v1098_v18, %v1097_v43 }
 0x570   :  { %v1100_v19 = vrot.slane %v1099_v50, 1 }
 0x572   :  { %v1101_v24 = vadd.f32 %v1100_v19, %v1099_v50 }
 0x574   :  { %v1103_v35 = vmul.f32 0.125, %v1101_v24 }
 0x576   :  { %v1170_v55 = vsel %vm1169_vm14, %v1103_v35, 0.0 }
 0x577   :  { %v1173_v26 = vadd.f32 %v1172_v17, %v1170_v55 }
 0x579   :  { %v1176_v22 = vadd.f32 %v1175_v27, %v1173_v26 }
 0x57b   :  { %v1179_v58 = vadd.f32 %v1178_v23, %v1176_v22 }
 0x57d   :  { %1180 = vst [vmem:[#allocation18] sm:$0xff] %v1179_v58 }
 0x57e   :  { %1652 = shalt.err (!%p1649_p3)
}
 0x57f   :  { %s1653_s11 = scalar_lea.hbm %s2433_s16, 128 }
 0x580   :  { %p1654_p4 = scmp.ne.s32.totalorder %s2433_s16, %s1653_s11  ;;  %p1657_p5 = scmp.lt.u32.totalorder %s1653_s11, %s2433_s16 }
 0x582   :  { %p1659_p6 = pnand %p1657_p5, %p1654_p4 }
 0x584   :  { %1662 = shalt.err (!%p1659_p6)
}
 0x585   :  { %1244 = dma.vmem_to_hbm [thread:$0]  %s1242_s30, 128, %s2433_s16, [#allocation17]  }
 0x586   :  { %1669 = dma.done.wait [#allocation6], 2048  }
 0x587   :  { %1670 = vsyncadd [#allocation6], 4294965248 }
 0x588   :  { %1671 = dma.done.wait [#allocation14], 2064  }
 0x589   :  { %1672 = vsyncadd [#allocation14], 4294965232 }
 0x58a   :  { %1673 = dma.done.wait [#allocation17], 256  }
 0x58b   :  { %1674 = vsyncadd [#allocation17], 4294967040 }
 0x58c   :  { %1260 = vsyncpa [#allocation5], 1 }
 0x58d   :  { %1261 = vsyncpa [#allocation8], 1 }
 0x58e   :  { %1262 = vsyncpa [#allocation11], 1 }
 0x58f   :  { %1263 = vsyncpa [#allocation6], 1 }
 0x590   :  { %1264 = vsyncpa [#allocation14], 1 }
 0x591   :  { %1265 = vsyncpa [#allocation17], 1 }

</bundles_post_ra>
